<compile_context>
chip_gen: v7x
topology: tpu7x:2x2x1
jax: 0.10.0
libtpu: 0.0.40
codegen_flags: <defaults>
</compile_context>

<pallas_src>
import math
import functools

import jax
import jax.numpy as jnp
from jax.experimental import pallas as pl
from jax.experimental.pallas import tpu as pltpu

NEG_SLOPE = 0.4
HIDDEN_DIMS = [3, 4, 8, 16, 32, 64, 128, 256, 512]   # + dim_output appended
N_LAYERS = 9
N_PACKED_LAYERS = 6     # layers 1..6 (3->4 ... 64->128) get row packing
N_SMALL = 7             # layers 1..7 share one packed weight buffer


def _round_up(x, m):
    return ((x + m - 1) // m) * m


def _cdiv(a, b):
    return -(-a // b)


def _leaky_relu(x):
    # max(x, 0.4*x) == LeakyReLU(negative_slope=0.4) since the slope < 1.
    return jnp.maximum(x, NEG_SLOPE * x)


def _layer_dims(dim_output):
    dims = HIDDEN_DIMS + [dim_output]
    return tuple((dims[i], dims[i + 1]) for i in range(N_LAYERS))


def _packed_layout(dim_output, r):
    """Static (python-int) layout shared by the host-side packer and kernel."""
    kn = _layer_dims(dim_output)
    n_pad = _round_up(dim_output, 128)            # lane-dense output width
    eff = []
    for i, (k, n) in enumerate(kn):
        if i < N_PACKED_LAYERS:
            eff.append((k * r, n * r))            # block-diagonal kron(I_r, W)
        elif i == N_LAYERS - 1:
            eff.append((k, n_pad))                # zero-padded last layer
        else:
            eff.append((k, n))
    # Small-weight pack: each segment's rows 16-aligned (bf16 sublane tile),
    # common lane width = max N among the small layers, 128-aligned.
    seg_off, rows = [], 0
    for i in range(N_SMALL):
        seg_off.append(rows)
        rows += _round_up(eff[i][0], 16)
    pack_lanes = _round_up(max(n for _, n in eff[:N_SMALL]), 128)
    # Bias pack: every per-layer segment starts at a 128-aligned lane offset.
    b_off, cur = [], 0
    for i in range(N_LAYERS):
        b_off.append(cur)
        cur += _round_up(eff[i][1], 128)
    return dict(eff=tuple(eff), seg_off=tuple(seg_off),
                pack_shape=(rows, pack_lanes),
                b_off=tuple(b_off), b_total=cur, n_pad=n_pad)


def choose_pack_rows(batch, max_pack_rows=4):
    """Row-packing factor: power of two <= max_pack_rows, small enough that
    the packed tile still has >= 8 sublanes."""
    r = 1
    while r * 2 <= max_pack_rows and 8 * (r * 2) <= _round_up(max(batch, 1), 8):
        r *= 2
    return r


def _pick_block_m(batch, requested, r):
    """Batch-tile size.  Always a multiple of 8*r (so every block / slice is
    (8,128)-tile aligned); sized so the grid has >=2 steps once B >= 64
    (both v7x TensorCores busy) and >=2 steps per core once B >= 512."""
    q = 8 * r
    cap = max(q, _round_up(min(max(requested, 8), 1024), q))   # default 512
    if batch <= 32:
        bm = _round_up(batch, q)
    elif batch < 512:
        bm = _round_up(_cdiv(batch, 2), q)
    else:
        bm = _round_up(_cdiv(batch, 4), max(q, 128))
    return max(q, min(cap, bm))


def init_decoder_params(dim_output, key):
    """Mirror the PyTorch init: xavier_uniform_ weights and the default
    U(-1/sqrt(fan_in), 1/sqrt(fan_in)) biases.  Weights are returned already
    transposed to (in, out), float32."""
    dims = HIDDEN_DIMS + [dim_output]
    weights, biases = [], []
    for i in range(N_LAYERS):
        fan_in, fan_out = dims[i], dims[i + 1]
        key, kw, kb = jax.random.split(key, 3)
        a = math.sqrt(6.0 / (fan_in + fan_out))                  # xavier_uniform
        weights.append(jax.random.uniform(kw, (fan_in, fan_out), jnp.float32, -a, a))
        bnd = 1.0 / math.sqrt(fan_in)                            # PyTorch bias default
        biases.append(jax.random.uniform(kb, (fan_out,), jnp.float32, -bnd, bnd))
    return weights, biases


def prepare_decoder_params(weights, biases, dim_output, *, pack_rows=4,
                           param_dtype=jnp.bfloat16):
    """Host-side (run once) packing of the 9 Linear layers:
      wpack : layers 1..6 as block-diagonal kron(I_r, W_i) plus plain W7,
              stacked into one (rows, lanes) buffer, `param_dtype`
      w8    : (256, 512)            `param_dtype`
      w9    : (512, n_pad)          `param_dtype`, zero-padded columns
      bias  : (1, b_total) float32, per-layer segments at 128-aligned offsets
              (packed-layer biases tiled r times)."""
    r = pack_rows
    lay = _packed_layout(dim_output, r)
    eff, seg_off = lay["eff"], lay["seg_off"]

    wpack = jnp.zeros(lay["pack_shape"], jnp.float32)
    for i in range(N_SMALL):
        w = weights[i].astype(jnp.float32)
        if i < N_PACKED_LAYERS and r > 1:
            w = jnp.kron(jnp.eye(r, dtype=jnp.float32), w)       # block-diagonal
        k, n = eff[i]
        wpack = wpack.at[seg_off[i]:seg_off[i] + k, :n].set(w)

    w9 = jnp.zeros((eff[8][0], lay["n_pad"]), jnp.float32)
    w9 = w9.at[:, :dim_output].set(weights[8].astype(jnp.float32))

    bias = jnp.zeros((1, lay["b_total"]), jnp.float32)
    for i in range(N_LAYERS):
        b = biases[i].astype(jnp.float32).reshape(1, -1)
        if i < N_PACKED_LAYERS and r > 1:
            b = jnp.tile(b, (1, r))
        bias = bias.at[:, lay["b_off"][i]:lay["b_off"][i] + b.shape[1]].set(b)

    return dict(wpack=wpack.astype(param_dtype),
                w8=weights[7].astype(param_dtype),
                w9=w9.astype(param_dtype),
                bias=bias)


def _decoder_kernel(lay, r, bm, x_ref, bias_ref, wpack_ref, w8_ref, w9_ref,
                    out_ref, *scratch):
    """One batch tile: 9 x (MXU matmul bf16 x bf16 -> f32 acc, f32 bias add,
    LeakyReLU(0.4)).  Dropout(p=0.0) is the identity and is omitted.
    Layers 1..6 run on lane-packed rows (r batch rows per activation row,
    block-diagonal weights); rows are un-packed before the 128->256 layer."""
    eff, seg, boff = lay["eff"], lay["seg_off"], lay["b_off"]
    mxu_dtype = wpack_ref.dtype

    h = x_ref[...]                                       # (bm//r, r*3) bf16
    for i in range(N_SMALL):
        if i == N_PACKED_LAYERS and r > 1:
            # Un-pack rows: (bm//r, r*128) -> (bm, 128).  The strided host-side
            # packing makes this a set of aligned sublane copies through a
            # VMEM scratch (no in-kernel transpose / reshape needed).
            unpack_ref = scratch[0]
            rows, lanes = bm // r, eff[i - 1][1] // r
            for j in range(r):
                unpack_ref[j * rows:(j + 1) * rows, :] = h[:, j * lanes:(j + 1) * lanes]
            h = unpack_ref[...]
        k, n = eff[i]
        w = wpack_ref[seg[i]:seg[i] + k, :n]             # static, aligned slice
        y = jnp.dot(h.astype(mxu_dtype), w, preferred_element_type=jnp.float32)
        h = _leaky_relu(y + bias_ref[:, boff[i]:boff[i] + n])

    # Layer 8: 256 -> 512.
    y = jnp.dot(h.astype(mxu_dtype), w8_ref[...], preferred_element_type=jnp.float32)
    h = _leaky_relu(y + bias_ref[:, boff[7]:boff[7] + eff[7][1]])

    # Layer 9: 512 -> n_pad (lane-dense, zero-padded columns), final LeakyReLU.
    y = jnp.dot(h.astype(mxu_dtype), w9_ref[...], preferred_element_type=jnp.float32)
    h = _leaky_relu(y + bias_ref[:, boff[8]:boff[8] + eff[8][1]])
    out_ref[...] = h.astype(out_ref.dtype)


@functools.partial(jax.jit, static_argnames=("dim_output", "pack_rows", "block_m"))
def decoder_forward(x, params, *, dim_output, pack_rows=4, block_m=512):
    """x: (..., 3).  params: output of prepare_decoder_params built with the
    same `pack_rows`.  Returns (..., dim_output) float32.
    block_m may be raised to 1024 for very large batches on 128-MiB-VMEM
    parts (v5e/v6e); keep the default 512 on v7x."""
    r = pack_rows
    lay = _packed_layout(dim_output, r)
    wpack, w8, w9, bias = params["wpack"], params["w8"], params["w9"], params["bias"]
    if tuple(wpack.shape) != lay["pack_shape"]:
        raise ValueError(
            f"params were packed for a different pack_rows; expected wpack "
            f"shape {lay['pack_shape']}, got {tuple(wpack.shape)}")
    din = x.shape[-1]
    if din != HIDDEN_DIMS[0]:
        raise ValueError(f"decoder expects {HIDDEN_DIMS[0]} input features, got {din}")

    lead = x.shape[:-1]
    xb = x.reshape(-1, din).astype(wpack.dtype)          # bf16 x DMA
    B = xb.shape[0]

    bm = _pick_block_m(B, block_m, r)
    b_pad = _round_up(max(B, 1), bm)
    grid = b_pad // bm
    if b_pad != B:
        xb = jnp.pad(xb, ((0, b_pad - B), (0, 0)))
    if r > 1:
        # Per-tile "strided" row packing: packed row p, lane slot j holds tile
        # row j*(bm//r) + p, so the in-kernel un-pack is a plain sequence of
        # aligned sublane block copies that lands rows back in original order.
        xb = (xb.reshape(grid, r, bm // r, din)
                .transpose(0, 2, 1, 3)
                .reshape(grid * (bm // r), r * din))

    n_pad = lay["n_pad"]
    scratch_shapes = []
    if r > 1:
        scratch_shapes.append(
            pltpu.VMEM((bm, HIDDEN_DIMS[N_PACKED_LAYERS]), jnp.float32))

    kernel = functools.partial(_decoder_kernel, lay, r, bm)
    out = pl.pallas_call(
        kernel,
        out_shape=jax.ShapeDtypeStruct((b_pad, n_pad), jnp.float32),
        grid_spec=pltpu.PrefetchScalarGridSpec(
            num_scalar_prefetch=0,
            grid=(grid,),
            in_specs=[
                pl.BlockSpec((bm // r, r * din), lambda i: (i, 0)),
                # Parameters: whole-array blocks with a constant index_map --
                # DMA'd once and revisited on every grid step.
                pl.BlockSpec(bias.shape, lambda i: (0, 0)),
                pl.BlockSpec(wpack.shape, lambda i: (0, 0)),
                pl.BlockSpec(w8.shape, lambda i: (0, 0)),
                pl.BlockSpec(w9.shape, lambda i: (0, 0)),
            ],
            out_specs=pl.BlockSpec((bm, n_pad), lambda i: (i, 0)),
            scratch_shapes=scratch_shapes,
        ),
        compiler_params=pltpu.CompilerParams(
            dimension_semantics=("parallel",),
            # ~10 MiB peak at bm=512; 32 MiB leaves headroom on every
            # generation including v7x's 64 MiB VMEM.
            vmem_limit_bytes=32 * 1024 * 1024,
        ),
    )(xb, bias, wpack, w8, w9)

    if b_pad != B or n_pad != dim_output:
        out = out[:B, :dim_output]
    return out.reshape(*lead, dim_output)


def decoder_reference(x, weights, biases, *, param_dtype=jnp.float32):
    """Pure-JAX reference.  param_dtype=bfloat16 reproduces the kernel's dtype
    semantics (bf16 matmul inputs, f32 accumulation/bias/LeakyReLU);
    float32 is the faithful PyTorch-module reference."""
    lead = x.shape[:-1]
    h = x.reshape(-1, x.shape[-1]).astype(param_dtype).astype(jnp.float32)
    for w, b in zip(weights, biases):
        y = jnp.dot(h.astype(param_dtype), w.astype(param_dtype),
                    preferred_element_type=jnp.float32)
        h = _leaky_relu(y + b.astype(jnp.float32).reshape(1, -1))
    return h.reshape(*lead, -1)


if __name__ == "__main__":
    key = jax.random.PRNGKey(0)
    dim_output = 784                       # e.g. a 28x28 image decoder
    key, kparam = jax.random.split(key)
    weights, biases = init_decoder_params(dim_output, kparam)

    # Two small shapes: a single-tile grid (batch=16, r=2) and a multi-step
    # grid with batch padding (batch=96 -> bm=64, 2 steps, r=4).
    for batch in (16, 96):
        kx = jax.random.fold_in(key, batch)
        x = jax.random.normal(kx, (batch, HIDDEN_DIMS[0]), jnp.float32)

        r = choose_pack_rows(batch, max_pack_rows=4)
        params = prepare_decoder_params(weights, biases, dim_output, pack_rows=r)
        out = decoder_forward(x, params, dim_output=dim_output,
                              pack_rows=r, block_m=512)
        out = jax.block_until_ready(out)
        assert out.shape == (batch, dim_output), out.shape

        # Exact-semantics check (bf16 matmul inputs, f32 accumulation).
        ref_bf16 = decoder_reference(x, weights, biases, param_dtype=jnp.bfloat16)
        max_err = float(jnp.max(jnp.abs(out - ref_bf16)))
        assert jnp.allclose(out, ref_bf16, atol=1e-2, rtol=1e-2), \
            f"batch={batch}: mismatch vs bf16-semantics reference: {max_err}"

        # True-f32 module reference; bf16 parameter/activation quantization is
        # the only deviation from the PyTorch module.
        ref_f32 = decoder_reference(x, weights, biases, param_dtype=jnp.float32)
        rel = float(jnp.linalg.norm(out - ref_f32) /
                    (jnp.linalg.norm(ref_f32) + 1e-12))
        assert rel < 5e-2, f"batch={batch}: f32-reference relative error {rel}"

    print("KERNEL_OK")
</pallas_src>

<mosaic_0001>
module attributes {stable_mosaic.version = 11 : i64} {
  func.func @_decoder_kernel(%arg0: i32, %arg1: memref<8x6xbf16, #tpu.memory_space<vmem>>, %arg2: memref<1x2560xf32, #tpu.memory_space<vmem>>, %arg3: memref<400x256xbf16, #tpu.memory_space<vmem>>, %arg4: memref<256x512xbf16, #tpu.memory_space<vmem>>, %arg5: memref<512x896xbf16, #tpu.memory_space<vmem>>, %arg6: memref<16x896xf32, #tpu.memory_space<vmem>>, %arg7: memref<16x128xf32, #tpu.memory_space<vmem>>) attributes {dimension_semantics = [#tpu.dimension_semantics<parallel>], iteration_bounds = array<i64: 1>, scalar_prefetch = 0 : i64, scratch_operands = 1 : i64, tpu.core_type = #tpu.core_type<tc>, window_params = [{transform_indices = @transform_0, window_bounds = array<i64: 8, 6>}, {pipeline_mode = #tpu.pipeline_mode<synchronous>, transform_indices = @transform_1, window_bounds = array<i64: 1, 2560>}, {pipeline_mode = #tpu.pipeline_mode<synchronous>, transform_indices = @transform_2, window_bounds = array<i64: 400, 256>}, {pipeline_mode = #tpu.pipeline_mode<synchronous>, transform_indices = @transform_3, window_bounds = array<i64: 256, 512>}, {pipeline_mode = #tpu.pipeline_mode<synchronous>, transform_indices = @transform_4, window_bounds = array<i64: 512, 896>}, {transform_indices = @transform_5, window_bounds = array<i64: 16, 896>}]} {
    %c0 = arith.constant 0 : index
    %c0_0 = arith.constant 0 : index
    %0 = vector.load %arg1[%c0, %c0_0] : memref<8x6xbf16, #tpu.memory_space<vmem>>, vector<8x6xbf16>
    %c0_1 = arith.constant 0 : index
    %c0_2 = arith.constant 0 : index
    %1 = vector.load %arg3[%c0_1, %c0_2] : memref<400x256xbf16, #tpu.memory_space<vmem>>, vector<6x8xbf16>
    %cst = arith.constant dense<0.000000e+00> : vector<8x8xf32>
    %2 = tpu.matmul %0, %1, %cst {dimension_numbers = #tpu.dot_dimension_numbers<[1], [0], [0], [1], [0, 0, 1, 1], [], []>} : vector<8x6xbf16>, vector<6x8xbf16>, vector<8x8xf32> -> vector<8x8xf32>
    %c0_3 = arith.constant 0 : index
    %c0_4 = arith.constant 0 : index
    %3 = vector.load %arg2[%c0_3, %c0_4] : memref<1x2560xf32, #tpu.memory_space<vmem>>, vector<1x8xf32>
    %4 = vector.broadcast %3 : vector<1x8xf32> to vector<8x8xf32>
    %5 = arith.addf %2, %4 : vector<8x8xf32>
    %cst_5 = arith.constant 4.000000e-01 : f32
    %6 = vector.broadcast %cst_5 : f32 to vector<8x8xf32>
    %7 = arith.mulf %6, %5 : vector<8x8xf32>
    %8 = arith.maximumf %5, %7 : vector<8x8xf32>
    %c16 = arith.constant 16 : index
    %c0_6 = arith.constant 0 : index
    %9 = vector.load %arg3[%c16, %c0_6] : memref<400x256xbf16, #tpu.memory_space<vmem>>, vector<8x16xbf16>
    %10 = arith.truncf %8 : vector<8x8xf32> to vector<8x8xbf16>
    %cst_7 = arith.constant dense<0.000000e+00> : vector<8x16xf32>
    %11 = tpu.matmul %10, %9, %cst_7 {dimension_numbers = #tpu.dot_dimension_numbers<[1], [0], [0], [1], [0, 0, 1, 1], [], []>} : vector<8x8xbf16>, vector<8x16xbf16>, vector<8x16xf32> -> vector<8x16xf32>
    %c0_8 = arith.constant 0 : index
    %c128 = arith.constant 128 : index
    %12 = vector.load %arg2[%c0_8, %c128] : memref<1x2560xf32, #tpu.memory_space<vmem>>, vector<1x16xf32>
    %13 = vector.broadcast %12 : vector<1x16xf32> to vector<8x16xf32>
    %14 = arith.addf %11, %13 : vector<8x16xf32>
    %cst_9 = arith.constant 4.000000e-01 : f32
    %15 = vector.broadcast %cst_9 : f32 to vector<8x16xf32>
    %16 = arith.mulf %15, %14 : vector<8x16xf32>
    %17 = arith.maximumf %14, %16 : vector<8x16xf32>
    %c32 = arith.constant 32 : index
    %c0_10 = arith.constant 0 : index
    %18 = vector.load %arg3[%c32, %c0_10] : memref<400x256xbf16, #tpu.memory_space<vmem>>, vector<16x32xbf16>
    %19 = arith.truncf %17 : vector<8x16xf32> to vector<8x16xbf16>
    %cst_11 = arith.constant dense<0.000000e+00> : vector<8x32xf32>
    %20 = tpu.matmul %19, %18, %cst_11 {dimension_numbers = #tpu.dot_dimension_numbers<[1], [0], [0], [1], [0, 0, 1, 1], [], []>} : vector<8x16xbf16>, vector<16x32xbf16>, vector<8x32xf32> -> vector<8x32xf32>
    %c0_12 = arith.constant 0 : index
    %c256 = arith.constant 256 : index
    %21 = vector.load %arg2[%c0_12, %c256] : memref<1x2560xf32, #tpu.memory_space<vmem>>, vector<1x32xf32>
    %22 = vector.broadcast %21 : vector<1x32xf32> to vector<8x32xf32>
    %23 = arith.addf %20, %22 : vector<8x32xf32>
    %cst_13 = arith.constant 4.000000e-01 : f32
    %24 = vector.broadcast %cst_13 : f32 to vector<8x32xf32>
    %25 = arith.mulf %24, %23 : vector<8x32xf32>
    %26 = arith.maximumf %23, %25 : vector<8x32xf32>
    %c48 = arith.constant 48 : index
    %c0_14 = arith.constant 0 : index
    %27 = vector.load %arg3[%c48, %c0_14] : memref<400x256xbf16, #tpu.memory_space<vmem>>, vector<32x64xbf16>
    %28 = arith.truncf %26 : vector<8x32xf32> to vector<8x32xbf16>
    %cst_15 = arith.constant dense<0.000000e+00> : vector<8x64xf32>
    %29 = tpu.matmul %28, %27, %cst_15 {dimension_numbers = #tpu.dot_dimension_numbers<[1], [0], [0], [1], [0, 0, 1, 1], [], []>} : vector<8x32xbf16>, vector<32x64xbf16>, vector<8x64xf32> -> vector<8x64xf32>
    %c0_16 = arith.constant 0 : index
    %c384 = arith.constant 384 : index
    %30 = vector.load %arg2[%c0_16, %c384] : memref<1x2560xf32, #tpu.memory_space<vmem>>, vector<1x64xf32>
    %31 = vector.broadcast %30 : vector<1x64xf32> to vector<8x64xf32>
    %32 = arith.addf %29, %31 : vector<8x64xf32>
    %cst_17 = arith.constant 4.000000e-01 : f32
    %33 = vector.broadcast %cst_17 : f32 to vector<8x64xf32>
    %34 = arith.mulf %33, %32 : vector<8x64xf32>
    %35 = arith.maximumf %32, %34 : vector<8x64xf32>
    %c80 = arith.constant 80 : index
    %c0_18 = arith.constant 0 : index
    %36 = vector.load %arg3[%c80, %c0_18] : memref<400x256xbf16, #tpu.memory_space<vmem>>, vector<64x128xbf16>
    %37 = arith.truncf %35 : vector<8x64xf32> to vector<8x64xbf16>
    %cst_19 = arith.constant dense<0.000000e+00> : vector<8x128xf32>
    %38 = tpu.matmul %37, %36, %cst_19 {dimension_numbers = #tpu.dot_dimension_numbers<[1], [0], [0], [1], [0, 0, 1, 1], [], []>} : vector<8x64xbf16>, vector<64x128xbf16>, vector<8x128xf32> -> vector<8x128xf32>
    %c0_20 = arith.constant 0 : index
    %c512 = arith.constant 512 : index
    %39 = vector.load %arg2[%c0_20, %c512] : memref<1x2560xf32, #tpu.memory_space<vmem>>, vector<1x128xf32>
    %40 = vector.broadcast %39 : vector<1x128xf32> to vector<8x128xf32>
    %41 = arith.addf %38, %40 : vector<8x128xf32>
    %cst_21 = arith.constant 4.000000e-01 : f32
    %42 = vector.broadcast %cst_21 : f32 to vector<8x128xf32>
    %43 = arith.mulf %42, %41 : vector<8x128xf32>
    %44 = arith.maximumf %41, %43 : vector<8x128xf32>
    %c144 = arith.constant 144 : index
    %c0_22 = arith.constant 0 : index
    %45 = vector.load %arg3[%c144, %c0_22] : memref<400x256xbf16, #tpu.memory_space<vmem>>, vector<128x256xbf16>
    %46 = arith.truncf %44 : vector<8x128xf32> to vector<8x128xbf16>
    %cst_23 = arith.constant dense<0.000000e+00> : vector<8x256xf32>
    %47 = tpu.matmul %46, %45, %cst_23 {dimension_numbers = #tpu.dot_dimension_numbers<[1], [0], [0], [1], [0, 0, 1, 1], [], []>} : vector<8x128xbf16>, vector<128x256xbf16>, vector<8x256xf32> -> vector<8x256xf32>
    %c0_24 = arith.constant 0 : index
    %c640 = arith.constant 640 : index
    %48 = vector.load %arg2[%c0_24, %c640] : memref<1x2560xf32, #tpu.memory_space<vmem>>, vector<1x256xf32>
    %49 = vector.broadcast %48 : vector<1x256xf32> to vector<8x256xf32>
    %50 = arith.addf %47, %49 : vector<8x256xf32>
    %cst_25 = arith.constant 4.000000e-01 : f32
    %51 = vector.broadcast %cst_25 : f32 to vector<8x256xf32>
    %52 = arith.mulf %51, %50 : vector<8x256xf32>
    %53 = arith.maximumf %50, %52 : vector<8x256xf32>
    %54 = vector.extract_strided_slice %53 {offsets = [0, 0], sizes = [8, 128], strides = [1, 1]} : vector<8x256xf32> to vector<8x128xf32>
    %c0_26 = arith.constant 0 : index
    %c0_27 = arith.constant 0 : index
    %55 = vector.load %arg7[%c0_26, %c0_27] : memref<16x128xf32, #tpu.memory_space<vmem>>, vector<8x128xf32>
    tpu.vector_store %arg7[%c0_26, %c0_27], %54 {strides = array<i32>} : memref<16x128xf32, #tpu.memory_space<vmem>>, vector<8x128xf32>,
    %56 = vector.extract_strided_slice %53 {offsets = [0, 128], sizes = [8, 128], strides = [1, 1]} : vector<8x256xf32> to vector<8x128xf32>
    %c8 = arith.constant 8 : index
    %c0_28 = arith.constant 0 : index
    %57 = vector.load %arg7[%c8, %c0_28] : memref<16x128xf32, #tpu.memory_space<vmem>>, vector<8x128xf32>
    tpu.vector_store %arg7[%c8, %c0_28], %56 {strides = array<i32>} : memref<16x128xf32, #tpu.memory_space<vmem>>, vector<8x128xf32>,
    %c0_29 = arith.constant 0 : index
    %c0_30 = arith.constant 0 : index
    %58 = vector.load %arg7[%c0_29, %c0_30] : memref<16x128xf32, #tpu.memory_space<vmem>>, vector<16x128xf32>
    %c272 = arith.constant 272 : index
    %c0_31 = arith.constant 0 : index
    %59 = vector.load %arg3[%c272, %c0_31] : memref<400x256xbf16, #tpu.memory_space<vmem>>, vector<128x256xbf16>
    %60 = arith.truncf %58 : vector<16x128xf32> to vector<16x128xbf16>
    %cst_32 = arith.constant dense<0.000000e+00> : vector<16x256xf32>
    %61 = tpu.matmul %60, %59, %cst_32 {dimension_numbers = #tpu.dot_dimension_numbers<[1], [0], [0], [1], [0, 0, 1, 1], [], []>} : vector<16x128xbf16>, vector<128x256xbf16>, vector<16x256xf32> -> vector<16x256xf32>
    %c0_33 = arith.constant 0 : index
    %c896 = arith.constant 896 : index
    %62 = vector.load %arg2[%c0_33, %c896] : memref<1x2560xf32, #tpu.memory_space<vmem>>, vector<1x256xf32>
    %63 = vector.broadcast %62 : vector<1x256xf32> to vector<16x256xf32>
    %64 = arith.addf %61, %63 : vector<16x256xf32>
    %cst_34 = arith.constant 4.000000e-01 : f32
    %65 = vector.broadcast %cst_34 : f32 to vector<16x256xf32>
    %66 = arith.mulf %65, %64 : vector<16x256xf32>
    %67 = arith.maximumf %64, %66 : vector<16x256xf32>
    %68 = arith.truncf %67 : vector<16x256xf32> to vector<16x256xbf16>
    %c0_35 = arith.constant 0 : index
    %c0_36 = arith.constant 0 : index
    %69 = vector.load %arg4[%c0_35, %c0_36] : memref<256x512xbf16, #tpu.memory_space<vmem>>, vector<256x512xbf16>
    %cst_37 = arith.constant dense<0.000000e+00> : vector<16x512xf32>
    %70 = tpu.matmul %68, %69, %cst_37 {dimension_numbers = #tpu.dot_dimension_numbers<[1], [0], [0], [1], [0, 0, 1, 1], [], []>} : vector<16x256xbf16>, vector<256x512xbf16>, vector<16x512xf32> -> vector<16x512xf32>
    %c0_38 = arith.constant 0 : index
    %c1152 = arith.constant 1152 : index
    %71 = vector.load %arg2[%c0_38, %c1152] : memref<1x2560xf32, #tpu.memory_space<vmem>>, vector<1x512xf32>
    %72 = vector.broadcast %71 : vector<1x512xf32> to vector<16x512xf32>
    %73 = arith.addf %70, %72 : vector<16x512xf32>
    %cst_39 = arith.constant 4.000000e-01 : f32
    %74 = vector.broadcast %cst_39 : f32 to vector<16x512xf32>
    %75 = arith.mulf %74, %73 : vector<16x512xf32>
    %76 = arith.maximumf %73, %75 : vector<16x512xf32>
    %77 = arith.truncf %76 : vector<16x512xf32> to vector<16x512xbf16>
    %c0_40 = arith.constant 0 : index
    %c0_41 = arith.constant 0 : index
    %78 = vector.load %arg5[%c0_40, %c0_41] : memref<512x896xbf16, #tpu.memory_space<vmem>>, vector<512x896xbf16>
    %cst_42 = arith.constant dense<0.000000e+00> : vector<16x896xf32>
    %79 = tpu.matmul %77, %78, %cst_42 {dimension_numbers = #tpu.dot_dimension_numbers<[1], [0], [0], [1], [0, 0, 1, 1], [], []>} : vector<16x512xbf16>, vector<512x896xbf16>, vector<16x896xf32> -> vector<16x896xf32>
    %c0_43 = arith.constant 0 : index
    %c1664 = arith.constant 1664 : index
    %80 = vector.load %arg2[%c0_43, %c1664] : memref<1x2560xf32, #tpu.memory_space<vmem>>, vector<1x896xf32>
    %81 = vector.broadcast %80 : vector<1x896xf32> to vector<16x896xf32>
    %82 = arith.addf %79, %81 : vector<16x896xf32>
    %cst_44 = arith.constant 4.000000e-01 : f32
    %83 = vector.broadcast %cst_44 : f32 to vector<16x896xf32>
    %84 = arith.mulf %83, %82 : vector<16x896xf32>
    %85 = arith.maximumf %82, %84 : vector<16x896xf32>
    %c0_45 = arith.constant 0 : index
    %c0_46 = arith.constant 0 : index
    %86 = vector.load %arg6[%c0_45, %c0_46] : memref<16x896xf32, #tpu.memory_space<vmem>>, vector<16x896xf32>
    tpu.vector_store %arg6[%c0_45, %c0_46], %85 {strides = array<i32>} : memref<16x896xf32, #tpu.memory_space<vmem>>, vector<16x896xf32>,
    return
  }
  func.func @transform_0(%arg0: i32) -> (i32, i32) {
    %c0_i32 = arith.constant 0 : i32
    %c0_i32_0 = arith.constant 0 : i32
    return %arg0, %c0_i32 : i32, i32
  }
  func.func @transform_1(%arg0: i32) -> (i32, i32) {
    %c0_i32 = arith.constant 0 : i32
    %c0_i32_0 = arith.constant 0 : i32
    %c0_i32_1 = arith.constant 0 : i32
    return %c0_i32, %c0_i32_0 : i32, i32
  }
  func.func @transform_2(%arg0: i32) -> (i32, i32) {
    %c0_i32 = arith.constant 0 : i32
    %c0_i32_0 = arith.constant 0 : i32
    %c0_i32_1 = arith.constant 0 : i32
    return %c0_i32, %c0_i32_0 : i32, i32
  }
  func.func @transform_3(%arg0: i32) -> (i32, i32) {
    %c0_i32 = arith.constant 0 : i32
    %c0_i32_0 = arith.constant 0 : i32
    %c0_i32_1 = arith.constant 0 : i32
    return %c0_i32, %c0_i32_0 : i32, i32
  }
  func.func @transform_4(%arg0: i32) -> (i32, i32) {
    %c0_i32 = arith.constant 0 : i32
    %c0_i32_0 = arith.constant 0 : i32
    %c0_i32_1 = arith.constant 0 : i32
    return %c0_i32, %c0_i32_0 : i32, i32
  }
  func.func @transform_5(%arg0: i32) -> (i32, i32) {
    %c0_i32 = arith.constant 0 : i32
    %c0_i32_0 = arith.constant 0 : i32
    return %arg0, %c0_i32 : i32, i32
  }
}

</mosaic_0001>

<bundles_post_ra>
// kernel: decoder_forward.1
= control target key start
LH: loop header
LB: loop body
LE: loop exit
PB: predicated region body
PF: predicated region fallthrough
CT: control target
= control target key end

     0   :  { %10 = vsyncpa [#allocation4], 0  ;;  %s4317_s0 = inlined_call_operand.vmem [shape: bf16[8,6], index: 0, kind: input, shape index: {}]   ;;  %s4318_s1 = inlined_call_operand.vmem [shape: f32[1,2560], index: 1, kind: input, shape index: {}]   ;;  %s4319_s2 = inlined_call_operand.hbm [shape: bf16[400,256], index: 2, kind: input, shape index: {}]   ;;  %s4320_s3 = inlined_call_operand.hbm [shape: bf16[256,512], index: 3, kind: input, shape index: {}]   ;;  %s4321_s4 = inlined_call_operand.hbm [shape: bf16[512,896], index: 4, kind: input, shape index: {}]   ;;  %s4322_s5 = inlined_call_operand.hbm [shape: f32[16,896], index: 5, kind: output, shape index: {}]  }
   0x1   :  { %11 = vsyncpa [#allocation7], 0 }
   0x2   :  { %12 = vsyncpa [#allocation5], 0  ;;  %s4113_s18 = smov [#allocation6]   ;;  %s4019_s22 = scalar_lea.hbm %s4320_s3, 8192 }
   0x3   :  { %s34_s19 = sshll.u32 %s4113_s18, 4  ;;  %p4020_p0 = scmp.ne.s32.totalorder %s4320_s3, %s4019_s22  ;;  %s35_s19 = int_to_ptr.vmem [resolvable:$true] %s34_s19 }
   0x4   :  { %p4023_p1 = scmp.lt.u32.totalorder %s4019_s22, %s4320_s3 }
   0x6   :  { %p4025_p2 = pnand %p4023_p1, %p4020_p0 }
   0x8   :  { %4028 = shalt.err (!%p4025_p2)
}
   0x9   :  { %s4029_s27 = scalar_lea.vmem %s35_s19, 8192  ;;  %p4034_p4 = scmp.lt.s32.totalorder %s35_s19, %s35_s19 }
   0xa   :  { %p4030_p3 = scmp.ne.s32.totalorder %s35_s19, %s4029_s27  ;;  %p4035_p5 = scmp.lt.s32.totalorder %s4029_s27, %s4029_s27 }
   0xc   :  { %p4036_p6 = por %p4035_p5, %p4034_p4 }
   0xe   :  { %p4037_p7 = pnand %p4036_p6, %p4030_p3 }
  0x10   :  { %4040 = shalt.err (!%p4037_p7)
}
  0x11   :  { %s4114_s28 = smov 256   ;;  %s4115_s29 = smov 16  }
  0x12   :  { %40 = dma.hbm_to_vmem [thread:$0]  %s4320_s3, 8192, %s35_s19, [#allocation7], %s4114_s28, %s4114_s28, %s4115_s29  }
  0x13   :  { %s4116_s7 = smov [#allocation3]   ;;  %s4041_s11 = scalar_lea.hbm %s4319_s2, 6400 }
  0x14   :  { %s22_s8 = sshll.u32 %s4116_s7, 4  ;;  %p4042_p8 = scmp.ne.s32.totalorder %s4319_s2, %s4041_s11  ;;  %s23_s8 = int_to_ptr.vmem [resolvable:$true] %s22_s8 }
  0x15   :  { %p4045_p9 = scmp.lt.u32.totalorder %s4041_s11, %s4319_s2 }
  0x17   :  { %p4047_p10 = pnand %p4045_p9, %p4042_p8 }
  0x19   :  { %4050 = shalt.err (!%p4047_p10)
}
  0x1a   :  { %s4051_s16 = scalar_lea.vmem %s23_s8, 6400  ;;  %p4056_p12 = scmp.lt.s32.totalorder %s23_s8, %s23_s8 }
  0x1b   :  { %p4052_p11 = scmp.ne.s32.totalorder %s23_s8, %s4051_s16  ;;  %p4057_p13 = scmp.lt.s32.totalorder %s4051_s16, %s4051_s16 }
  0x1d   :  { %p4058_p0 = por %p4057_p13, %p4056_p12 }
  0x1f   :  { %p4059_p1 = pnand %p4058_p0, %p4052_p11 }
  0x21   :  { %4062 = shalt.err (!%p4059_p1)
}
  0x22   :  { %s4117_s3 = smov 128   ;;  %s4118_s17 = smov 8  }
  0x23   :  { %28 = dma.hbm_to_vmem [thread:$0]  %s4319_s2, 6400, %s23_s8, [#allocation4], %s4117_s3, %s4117_s3, %s4118_s17  }
  0x24   :  { %s4119_s20 = smov [#allocation8]   ;;  %s4063_s24 = scalar_lea.hbm %s4321_s4, 28672 }
  0x25   :  { %s46_s21 = sshll.u32 %s4119_s20, 4  ;;  %p4064_p2 = scmp.ne.s32.totalorder %s4321_s4, %s4063_s24  ;;  %s47_s21 = int_to_ptr.vmem [resolvable:$true] %s46_s21 }
  0x26   :  { %p4067_p3 = scmp.lt.u32.totalorder %s4063_s24, %s4321_s4 }
  0x28   :  { %p4069_p4 = pnand %p4067_p3, %p4064_p2 }
  0x2a   :  { %4072 = shalt.err (!%p4069_p4)
}
  0x2b   :  { %s4073_s29 = scalar_lea.vmem %s47_s21, 28672  ;;  %p4078_p6 = scmp.lt.s32.totalorder %s47_s21, %s47_s21 }
  0x2c   :  { %p4074_p5 = scmp.ne.s32.totalorder %s47_s21, %s4073_s29  ;;  %p4079_p7 = scmp.lt.s32.totalorder %s4073_s29, %s4073_s29 }
  0x2e   :  { %p4080_p8 = por %p4079_p7, %p4078_p6 }
  0x30   :  { %p4081_p9 = pnand %p4080_p8, %p4074_p5 }
  0x32   :  { %4084 = shalt.err (!%p4081_p9)
}
  0x33   :  { %s4120_s2 = smov 448   ;;  %s4121_s30 = smov 28  }
  0x34   :  { %52 = dma.hbm_to_vmem [thread:$0]  %s4321_s4, 28672, %s47_s21, [#allocation7], %s4120_s2, %s4120_s2, %s4121_s30  }
  0x35   :  { %4107 = dma.done.wait [#allocation4], 6400  }
  0x36   :  { %4108 = vsyncadd [#allocation4], 4294960896 }
  0x37   :  { %4109 = dma.done.wait [#allocation7], 36864  }
  0x38   :  { %4110 = vsyncadd [#allocation7], 4294930432  ;;  %v4122_v0 = vmov 0.0   ;;  %vm4123_vm0 = vmmov 0   ;;  %vm76_vm1 = vcmask 1042432   ;;  %vm72_vm2 = vcmask 48128  }
  0x39   :  { %3471 = vmatprep.subr.bf16.mxu1 %v4122_v0  ;;  %3473 = vmatprep.mubr.msk.bf16.mxu1 %vm4123_vm0, %v4122_v0  ;;  %v64_v1 = vld [vmem:[#allocation3] sm:$0x7]  ;;  %v63_v2 = vld [vmem:[%s4317_s0] sm:$0xf]  ;;  %v122_v4 = vld [vmem:[#allocation3 + $0x10] sm:$0xf] }
  0x3a   :  { %3483 = vmatprep.subr.bf16.mxu0 %v4122_v0  ;;  %3485 = vmatprep.mubr.msk.bf16.mxu0 %vm4123_vm0, %v4122_v0  ;;  %v78_v3 = vsel %vm76_vm1, %v64_v1, 0  ;;  %vm135_vm3 = vcmask 1043456   ;;  %v3076_v6 = vld [vmem:[%s4318_s1] ss:$0 sm:$0xff]  ;;  %vm131_vm4 = vcmask 64512   ;;  %vm197_vm5 = vcmask 130048  }
  0x3b   :  { %3472 = vmatpush3.bf16.msra.mxu1 %v78_v3  ;;  %v137_v5 = vsel %vm135_vm3, %v122_v4, 0  ;;  %v3548_v15 = vld [vmem:[#allocation3 + $0x20] ss:$8 sps:$4 sm:$0xff]   ;;  %v3549_v25 = vld [vmem:[#allocation3 + $0x30] ss:$8 sps:$4 sm:$0xff]   ;;  %vm267_vm6 = vcmask 261120  }
  0x3c   :  { %3477 = vmatprep.subr.bf16.mxu1 %v4122_v0  ;;  %3484 = vmatpush3.bf16.msra.mxu0 %v3548_v15  ;;  %v3078_v16 = vld [vmem:[%s4318_s1 + $0x1] ss:$0 sm:$0xff]  ;;  %v3551_v27 = vld [vmem:[#allocation3 + $0x50] ss:$8 sps:$4 sm:$0xff]   ;;  %v3080_v29 = vld [vmem:[%s4318_s1 + $0x2] ss:$0 sm:$0xff] }
  0x3d   :  { %3497 = vmatprep.subr.bf16.mxu0 %v4122_v0  ;;  %v3550_v26 = vld [vmem:[#allocation3 + $0x40] ss:$8 sps:$4 sm:$0xff]   ;;  %v3553_v38 = vld [vmem:[#allocation3 + $0x70] ss:$8 sps:$4 sm:$0xff]   ;;  %v3557_v40 = vld [vmem:[#allocation3 + $0x94] ss:$8 sps:$4 sm:$0xff]  }
  0x3e   :  { %3474 = vmatmul.mubr.msk.bf16.vlgmr.msra.gmra.mrb[0].mxu1 %vm72_vm2, %v63_v2  ;;  %v3552_v28 = vld [vmem:[#allocation3 + $0x60] ss:$8 sps:$4 sm:$0xff]   ;;  %vm353_vm7 = vcmask 523264   ;;  %v3555_v49 = vld [vmem:[#allocation3 + $0x90] ss:$8 sps:$4 sm:$0xff]   ;;  %v4124_v1 = vmov 0  }
  0x3f   :  { %3479 = vmatprep.mubr.msk.bf16.mxu1 %vm4123_vm0, %v4122_v0  ;;  %3478 = vmatpush3.bf16.msra.mxu1 %v137_v5  ;;  %v3554_v39 = vld [vmem:[#allocation3 + $0x80] ss:$8 sps:$4 sm:$0xff]   ;;  %v3560_v51 = vld [vmem:[#allocation3 + $0xa4] ss:$8 sps:$4 sm:$0xff]   ;;  %v3563_v53 = vld [vmem:[#allocation3 + $0xb4] ss:$8 sps:$4 sm:$0xff]  }
  0x40   :  { %3489 = vmatprep.subr.bf16.mxu1 %v4122_v0  ;;  %v3083_v41 = vld [vmem:[%s4318_s1 + $0x3] ss:$0 sm:$0xff]  ;;  %v3561_v54 = vld [vmem:[#allocation3 + $0xb0] ss:$8 sps:$4 sm:$0xff]   ;;  %v3566_v55 = vld [vmem:[#allocation3 + $0xc4] ss:$8 sps:$4 sm:$0xff]  }
  0x41   :  { %v3558_v52 = vld [vmem:[#allocation3 + $0xa0] ss:$8 sps:$4 sm:$0xff]   ;;  %v3569_v57 = vld [vmem:[#allocation3 + $0xd4] ss:$8 sps:$4 sm:$0xff]   ;;  %v3567_v58 = vld [vmem:[#allocation3 + $0xd0] ss:$8 sps:$4 sm:$0xff]  }
  0x42   :  { %v3564_v56 = vld [vmem:[#allocation3 + $0xc0] ss:$8 sps:$4 sm:$0xff]   ;;  %v3572_v59 = vld [vmem:[#allocation3 + $0xe4] ss:$8 sps:$4 sm:$0xff]   ;;  %v3575_v61 = vld [vmem:[#allocation3 + $0xf4] ss:$8 sps:$4 sm:$0xff]  }
  0x43   :  { %v3570_v60 = vld [vmem:[#allocation3 + $0xe0] ss:$8 sps:$4 sm:$0xff]   ;;  %v3573_v62 = vld [vmem:[#allocation3 + $0xf0] ss:$8 sps:$4 sm:$0xff]   ;;  %v3578_v63 = vld [vmem:[#allocation3 + $0x104] ss:$8 sps:$4 sm:$0xff]  }
  0x44   :  { %v3581_v2 = vld [vmem:[#allocation3 + $0x114] ss:$8 sps:$4 sm:$0xff]   ;;  %v3087_v3 = vld [vmem:[%s4318_s1 + $0x4] ss:$0 sm:$0xff] }
  0x45   :  { %v3587_v15 = vld [vmem:[#allocation3 + $0x134] ss:$8 sps:$4 sm:$0xff]  }
 0x111   :  { %v114_v7 = vpop.f32.mrb[0].mxu1 }
 0x112   :  { %v115_v8 = vadd.f32 %v3076_v6, %v114_v7  ;;  %v3475_v9 = vpop.f32.mrb[1].mxu1 }
 0x113   :  { %v117_v10 = vpop.f32.mrb[2].mxu1 }
 0x114   :  { %v120_v11 = vmul.f32 0.4, %v115_v8  ;;  %v3476_v12 = vpop.f32.mrb[3].mxu1 }
 0x116   :  { %v121_v13 = vmax.f32 %v115_v8, %v120_v11  ;;  %v3579_v11 = vld [vmem:[#allocation3 + $0x110] ss:$8 sps:$4 sm:$0xff]  }
 0x118   :  { %v123_v14 = vpack.c.bf16 %v121_v13, %v121_v13  ;;  %v3584_v13 = vld [vmem:[#allocation3 + $0x124] ss:$8 sps:$4 sm:$0xff]  }
 0x11a   :  { %3480 = vmatmul.mubr.msk.bf16.vlgmr.msra.gmra.mrb[4].mxu1 %vm131_vm4, %v123_v14  ;;  %v3582_v14 = vld [vmem:[#allocation3 + $0x120] ss:$8 sps:$4 sm:$0xff]  }
 0x11b   :  { %3493 = vmatprep.mubr.msk.bf16.mxu1 %vm4123_vm0, %v4122_v0  ;;  %3490 = vmatpush3.bf16.msra.mxu1 %v3549_v25  ;;  %v3602_v25 = vld [vmem:[#allocation3 + $0x184] ss:$8 sps:$4 sm:$0xff]  }
 0x11c   :  { %3491 = vmatprep.subr.bf16.mxu1 %v4122_v0 }
 0x11f   :  { %3492 = vmatpush3.bf16.msra.mxu1 %v3550_v26  ;;  %v3600_v26 = vld [vmem:[#allocation3 + $0x180] ss:$8 sps:$4 sm:$0xff]  }
 0x1ed   :  { %v173_v17 = vpop.f32.mrb[4].mxu1 }
 0x1ee   :  { %v174_v18 = vadd.f32 %v3078_v16, %v173_v17  ;;  %v3481_v19 = vpop.f32.mrb[5].mxu1  ;;  %v3585_v16 = vld [vmem:[#allocation3 + $0x130] ss:$8 sps:$4 sm:$0xff]   ;;  %v3590_v17 = vld [vmem:[#allocation3 + $0x144] ss:$8 sps:$4 sm:$0xff]  }
 0x1ef   :  { %v176_v20 = vpop.f32.mrb[6].mxu1  ;;  %v3593_v19 = vld [vmem:[#allocation3 + $0x154] ss:$8 sps:$4 sm:$0xff]  }
 0x1f0   :  { %v179_v21 = vmul.f32 0.4, %v174_v18  ;;  %v3482_v22 = vpop.f32.mrb[7].mxu1  ;;  %v3591_v20 = vld [vmem:[#allocation3 + $0x150] ss:$8 sps:$4 sm:$0xff]  }
 0x1f1   :  { %v3594_v22 = vld [vmem:[#allocation3 + $0x160] ss:$8 sps:$4 sm:$0xff]  }
 0x1f2   :  { %v180_v23 = vmax.f32 %v174_v18, %v179_v21  ;;  %v3588_v18 = vld [vmem:[#allocation3 + $0x140] ss:$8 sps:$4 sm:$0xff]   ;;  %v3596_v21 = vld [vmem:[#allocation3 + $0x164] ss:$8 sps:$4 sm:$0xff]  }
 0x1f4   :  { %v183_v24 = vpack.c.bf16 %v180_v23, %v180_v23  ;;  %v3599_v23 = vld [vmem:[#allocation3 + $0x174] ss:$8 sps:$4 sm:$0xff]  }
 0x1f6   :  { %3486 = vmatmul.mubr.msk.bf16.vlgmr.msra.gmra.mrb[0].mxu0 %vm197_vm5, %v183_v24  ;;  %v3597_v24 = vld [vmem:[#allocation3 + $0x170] ss:$8 sps:$4 sm:$0xff]  }
 0x1f7   :  { %3505 = vmatprep.mubr.msk.bf16.mxu0 %vm4123_vm0, %v4122_v0  ;;  %3498 = vmatpush3.bf16.msra.mxu0 %v3551_v27  ;;  %v3603_v27 = vld [vmem:[#allocation6] ss:$16 sps:$4 sm:$0xff]  }
 0x1f8   :  { %3499 = vmatprep.subr.bf16.mxu0 %v4122_v0 }
 0x1fb   :  { %3500 = vmatpush3.bf16.msra.mxu0 %v3552_v28  ;;  %v3605_v28 = vld [vmem:[#allocation6 + $0x4] ss:$16 sps:$4 sm:$0xff]  }
 0x1fc   :  { %3501 = vmatprep.subr.bf16.mxu0 %v4122_v0  ;;  %1125 = vmatprep.subr.bf16.mxu1 %v3605_v28  ;;  %v3666_v28 = vld [vmem:[#allocation6 + $0x148] ss:$16 sps:$4 sm:$0xff]  }
 0x1ff   :  { %3502 = vmatpush3.bf16.msra.mxu0 %v3553_v38  ;;  %v3635_v38 = vld [vmem:[#allocation6 + $0xa4] ss:$16 sps:$4 sm:$0xff]  }
 0x200   :  { %3503 = vmatprep.subr.bf16.mxu0 %v4122_v0  ;;  %v3576_v0 = vld [vmem:[#allocation3 + $0x100] ss:$8 sps:$4 sm:$0xff]  }
 0x203   :  { %3504 = vmatpush3.bf16.msra.mxu0 %v3554_v39  ;;  %v3633_v39 = vld [vmem:[#allocation6 + $0xa0] ss:$16 sps:$4 sm:$0xff]  }
 0x204   :  { %508 = vmatprep.subr.bf16.mxu0 %v3557_v40  ;;  %v3641_v40 = vld [vmem:[#allocation6 + $0xc4] ss:$16 sps:$4 sm:$0xff]  }
 0x2c9   :  { %v235_v30 = vpop.f32.mrb[0].mxu0 }
 0x2ca   :  { %v236_v31 = vadd.f32 %v3080_v29, %v235_v30  ;;  %v3487_v32 = vpop.f32.mrb[1].mxu0  ;;  %v3608_v29 = vld [vmem:[#allocation6 + $0xc] ss:$16 sps:$4 sm:$0xff]   ;;  %v3611_v30 = vld [vmem:[#allocation6 + $0x24] ss:$16 sps:$4 sm:$0xff]  }
 0x2cb   :  { %v238_v33 = vpop.f32.mrb[2].mxu0  ;;  %v3617_v32 = vld [vmem:[#allocation6 + $0x44] ss:$16 sps:$4 sm:$0xff]  }
 0x2cc   :  { %v241_v34 = vmul.f32 0.4, %v236_v31  ;;  %v3488_v35 = vpop.f32.mrb[3].mxu0  ;;  %v3615_v33 = vld [vmem:[#allocation6 + $0x40] ss:$16 sps:$4 sm:$0xff]  }
 0x2cd   :  { %v3621_v35 = vld [vmem:[#allocation6 + $0x60] ss:$16 sps:$4 sm:$0xff]  }
 0x2ce   :  { %v242_v36 = vmax.f32 %v236_v31, %v241_v34  ;;  %v3609_v31 = vld [vmem:[#allocation6 + $0x20] ss:$16 sps:$4 sm:$0xff]   ;;  %v3623_v34 = vld [vmem:[#allocation6 + $0x64] ss:$16 sps:$4 sm:$0xff]  }
 0x2d0   :  { %v247_v37 = vpack.c.bf16 %v242_v36, %v242_v36  ;;  %v3629_v36 = vld [vmem:[#allocation6 + $0x84] ss:$16 sps:$4 sm:$0xff]  }
 0x2d2   :  { %3494 = vmatmul.mubr.msk.bf16.vlgmr.msra.gmra.mrb[8].mxu1 %vm267_vm6, %v247_v37  ;;  %v3627_v37 = vld [vmem:[#allocation6 + $0x80] ss:$16 sps:$4 sm:$0xff]  }
 0x2d3   :  { %1126 = vmatpush1.bf16.msra.mxu1 %v3603_v27  ;;  %v3668_v27 = vld [vmem:[#allocation6 + $0x14c] ss:$16 sps:$4 sm:$0xff]  }
 0x2d4   :  { %1127 = vmatprep.subr.bf16.mxu1 %v3611_v30  ;;  %v3672_v30 = vld [vmem:[#allocation6 + $0x168] ss:$16 sps:$4 sm:$0xff]  }
 0x2d7   :  { %1128 = vmatpush1.bf16.msra.mxu1 %v3609_v31  ;;  %v3680_v31 = vld [vmem:[#allocation6 + $0x18c] ss:$16 sps:$4 sm:$0xff]  }
 0x2d8   :  { %1129 = vmatprep.subr.bf16.mxu1 %v3617_v32  ;;  %v3678_v32 = vld [vmem:[#allocation6 + $0x188] ss:$16 sps:$4 sm:$0xff]  }
 0x2db   :  { %1130 = vmatpush1.bf16.msra.mxu1 %v3615_v33  ;;  %v3683_v33 = vld [vmem:[#allocation6 + $0x1a4] ss:$16 sps:$4 sm:$0xff]  }
 0x2dc   :  { %1131 = vmatprep.subr.bf16.mxu1 %v3623_v34  ;;  %v3686_v34 = vld [vmem:[#allocation6 + $0x1ac] ss:$16 sps:$4 sm:$0xff]  }
 0x2df   :  { %1132 = vmatpush1.bf16.msra.mxu1 %v3621_v35  ;;  %v3681_v35 = vld [vmem:[#allocation6 + $0x1a0] ss:$16 sps:$4 sm:$0xff]  }
 0x2e0   :  { %1133 = vmatprep.subr.bf16.mxu1 %v3629_v36  ;;  %v3684_v36 = vld [vmem:[#allocation6 + $0x1a8] ss:$16 sps:$4 sm:$0xff]  }
 0x2e3   :  { %1134 = vmatpush1.bf16.msra.mxu1 %v3627_v37  ;;  %v3689_v37 = vld [vmem:[#allocation6 + $0x1c4] ss:$16 sps:$4 sm:$0xff]  }
 0x2e4   :  { %1135 = vmatprep.subr.bf16.mxu1 %v3635_v38  ;;  %v3692_v38 = vld [vmem:[#allocation6 + $0x1cc] ss:$16 sps:$4 sm:$0xff]  }
 0x2e7   :  { %1136 = vmatpush1.bf16.msra.mxu1 %v3633_v39  ;;  %v3687_v39 = vld [vmem:[#allocation6 + $0x1c0] ss:$16 sps:$4 sm:$0xff]  }
 0x2e8   :  { %1137 = vmatprep.subr.bf16.mxu1 %v3641_v40  ;;  %v3690_v40 = vld [vmem:[#allocation6 + $0x1c8] ss:$16 sps:$4 sm:$0xff]  }
 0x3a5   :  { %v305_v42 = vpop.f32.mrb[8].mxu1 }
 0x3a6   :  { %v306_v43 = vadd.f32 %v3083_v41, %v305_v42  ;;  %v3495_v44 = vpop.f32.mrb[9].mxu1  ;;  %v3639_v41 = vld [vmem:[#allocation6 + $0xc0] ss:$16 sps:$4 sm:$0xff]   ;;  %v3647_v42 = vld [vmem:[#allocation6 + $0xe4] ss:$16 sps:$4 sm:$0xff]  }
 0x3a7   :  { %v308_v45 = vpop.f32.mrb[10].mxu1  ;;  %1138 = vmatpush1.bf16.msra.mxu1 %v3639_v41  ;;  %v3653_v44 = vld [vmem:[#allocation6 + $0x104] ss:$16 sps:$4 sm:$0xff]  }
 0x3a8   :  { %v311_v46 = vmul.f32 0.4, %v306_v43  ;;  %v3496_v47 = vpop.f32.mrb[11].mxu1  ;;  %1139 = vmatprep.subr.bf16.mxu1 %v3647_v42  ;;  %v3651_v45 = vld [vmem:[#allocation6 + $0x100] ss:$16 sps:$4 sm:$0xff]  }
 0x3a9   :  { %v3657_v47 = vld [vmem:[#allocation6 + $0x120] ss:$16 sps:$4 sm:$0xff]   ;;  %v3695_v41 = vld [vmem:[#allocation6 + $0x1e4] ss:$16 sps:$4 sm:$0xff]   ;;  %v3698_v42 = vld [vmem:[#allocation6 + $0x1ec] ss:$16 sps:$4 sm:$0xff]  }
 0x3aa   :  { %v312_v48 = vmax.f32 %v306_v43, %v311_v46  ;;  %v3645_v43 = vld [vmem:[#allocation6 + $0xe0] ss:$16 sps:$4 sm:$0xff]   ;;  %v3659_v46 = vld [vmem:[#allocation6 + $0x124] ss:$16 sps:$4 sm:$0xff]  }
 0x3ab   :  { %1140 = vmatpush1.bf16.msra.mxu1 %v3645_v43  ;;  %v3693_v43 = vld [vmem:[#allocation6 + $0x1e0] ss:$16 sps:$4 sm:$0xff]  }
 0x3ac   :  { %v321_v50 = vpack.c.bf16 %v312_v48, %v312_v48  ;;  %1141 = vmatprep.subr.bf16.mxu1 %v3653_v44  ;;  %v3665_v48 = vld [vmem:[#allocation6 + $0x144] ss:$16 sps:$4 sm:$0xff]   ;;  %v3696_v44 = vld [vmem:[#allocation6 + $0x1e8] ss:$16 sps:$4 sm:$0xff]  }
 0x3ae   :  { %3506 = vmatmul.mubr.msk.bf16.vlgmr.msra.gmra.mrb[4].mxu0 %vm353_vm7, %v321_v50  ;;  %v3671_v50 = vld [vmem:[#allocation6 + $0x164] ss:$16 sps:$4 sm:$0xff]  }
 0x3af   :  { %509 = vmatpush1.bf16.msra.mxu0 %v3555_v49  ;;  %540 = vmatprep.mubr.bf16.mxu0 %v4124_v1  ;;  %v3663_v49 = vld [vmem:[#allocation6 + $0x140] ss:$16 sps:$4 sm:$0xff]  }
 0x3b0   :  { %510 = vmatprep.subr.bf16.mxu0 %v3560_v51  ;;  %1142 = vmatpush1.bf16.msra.mxu1 %v3651_v45  ;;  %v3669_v51 = vld [vmem:[#allocation6 + $0x160] ss:$16 sps:$4 sm:$0xff]  }
 0x3b1   :  { %1143 = vmatprep.subr.bf16.mxu1 %v3659_v46  ;;  %v3701_v45 = vld [vmem:[#allocation8 + $0x4] ss:$28 sps:$4 sm:$0xff]   ;;  %v3704_v46 = vld [vmem:[#allocation8 + $0xc] ss:$28 sps:$4 sm:$0xff]  }
 0x3b3   :  { %511 = vmatpush1.bf16.msra.mxu0 %v3558_v52  ;;  %v3677_v52 = vld [vmem:[#allocation6 + $0x184] ss:$16 sps:$4 sm:$0xff]  }
 0x3b4   :  { %512 = vmatprep.subr.bf16.mxu0 %v3563_v53  ;;  %1144 = vmatpush1.bf16.msra.mxu1 %v3657_v47  ;;  %v3675_v53 = vld [vmem:[#allocation6 + $0x180] ss:$16 sps:$4 sm:$0xff]  }
 0x3b5   :  { %1145 = vmatprep.subr.bf16.mxu1 %v3665_v48  ;;  %v574_v47 = vld [vmem:[%s4318_s1 + $0x7] sm:$0x3] }
 0x3b7   :  { %513 = vmatpush1.bf16.msra.mxu0 %v3561_v54  ;;  %v418_v54 = vlaneseq }
 0x3b8   :  { %514 = vmatprep.subr.bf16.mxu0 %v3566_v55  ;;  %1146 = vmatpush1.bf16.msra.mxu1 %v3663_v49 }
 0x3b9   :  { %1147 = vmatprep.subr.bf16.mxu1 %v3671_v50  ;;  %v4231_v55 = vshrl.u32 %v418_v54, 7 }
 0x3bb   :  { %515 = vmatpush1.bf16.msra.mxu0 %v3564_v56  ;;  %v4234_v56 = vsub.s32 0, %v4231_v55 }
 0x3bc   :  { %516 = vmatprep.subr.bf16.mxu0 %v3569_v57  ;;  %1148 = vmatpush1.bf16.msra.mxu1 %v3669_v51  ;;  %v416_v57 = vld [vmem:[%s4318_s1 + $0x5] sm:$0x3] }
 0x3bd   :  { %1149 = vmatprep.subr.bf16.mxu1 %v3677_v52  ;;  %v579_v48 = vrot.slane %v574_v47, %v4234_v56 }
 0x3bf   :  { %517 = vmatpush1.bf16.msra.mxu0 %v3567_v58  ;;  %v4240_v58 = vsub.s32 1, %v4231_v55 }
 0x3c0   :  { %518 = vmatprep.subr.bf16.mxu0 %v3572_v59  ;;  %1150 = vmatpush1.bf16.msra.mxu1 %v3675_v53  ;;  %v421_v59 = vrot.slane %v416_v57, %v4234_v56 }
 0x3c1   :  { %1151 = vmatprep.subr.bf16.mxu1 %v3683_v33  ;;  %v583_v49 = vrot.slane %v574_v47, %v4240_v58  ;;  %v3743_v33 = vld [vmem:[#allocation8 + $0x18c] ss:$28 sps:$4 sm:$0xff]  }
 0x3c2   :  { %v3759_v47 = vld [vmem:[#allocation8 + $0x230] ss:$28 sps:$4 sm:$0xff]  }
 0x3c3   :  { %519 = vmatpush1.bf16.msra.mxu0 %v3570_v60  ;;  %v425_v60 = vrot.slane %v416_v57, %v4240_v58 }
 0x3c4   :  { %520 = vmatprep.subr.bf16.mxu0 %v3575_v61  ;;  %1152 = vmatpush1.bf16.msra.mxu1 %v3681_v35  ;;  %v3741_v35 = vld [vmem:[#allocation8 + $0x188] ss:$28 sps:$4 sm:$0xff]  }
 0x3c5   :  { %1153 = vmatprep.subr.bf16.mxu1 %v3689_v37  ;;  %v3749_v37 = vld [vmem:[#allocation8 + $0x1c4] ss:$28 sps:$4 sm:$0xff]  }
 0x3c7   :  { %521 = vmatpush1.bf16.msra.mxu0 %v3573_v62 }
 0x3c8   :  { %522 = vmatprep.subr.bf16.mxu0 %v3578_v63  ;;  %1154 = vmatpush1.bf16.msra.mxu1 %v3687_v39  ;;  %v3747_v39 = vld [vmem:[#allocation8 + $0x1c0] ss:$28 sps:$4 sm:$0xff]  }
 0x3c9   :  { %1155 = vmatprep.subr.bf16.mxu1 %v3695_v41  ;;  %v3755_v41 = vld [vmem:[#allocation8 + $0x1fc] ss:$28 sps:$4 sm:$0xff]  }
 0x3cb   :  { %523 = vmatpush1.bf16.msra.mxu0 %v3576_v0 }
 0x3cc   :  { %666 = vmatprep.subr.bf16.mxu0 %v3581_v2  ;;  %1156 = vmatpush1.bf16.msra.mxu1 %v3693_v43  ;;  %v3753_v43 = vld [vmem:[#allocation8 + $0x1f8] ss:$28 sps:$4 sm:$0xff]  }
 0x3cd   :  { %2676 = vmatprep.subr.bf16.mxu1 %v3701_v45  ;;  %v3761_v45 = vld [vmem:[#allocation8 + $0x234] ss:$28 sps:$4 sm:$0xff]  }
 0x481   :  { %v391_v4 = vpop.f32.mrb[4].mxu0 }
 0x482   :  { %v392_v5 = vadd.f32 %v3087_v3, %v391_v4  ;;  %v3507_v6 = vpop.f32.mrb[5].mxu0 }
 0x483   :  { %v394_v7 = vpop.f32.mrb[6].mxu0 }
 0x484   :  { %v397_v8 = vmul.f32 0.4, %v392_v5  ;;  %v3508_v9 = vpop.f32.mrb[7].mxu0  ;;  %v3606_v7 = vld [vmem:[#allocation6 + $0x8] ss:$16 sps:$4 sm:$0xff]  }
 0x485   :  { %v3614_v9 = vld [vmem:[#allocation6 + $0x2c] ss:$16 sps:$4 sm:$0xff]  }
 0x486   :  { %v398_v10 = vmax.f32 %v392_v5, %v397_v8 }
 0x488   :  { %v415_v12 = vpack.c.bf16 %v398_v10, %v398_v10  ;;  %v3612_v10 = vld [vmem:[#allocation6 + $0x28] ss:$16 sps:$4 sm:$0xff]  }
 0x48a   :  { %541 = vmatmul.mubr.bf16.vlgmr.msra.gmra.mrb[8].mxu0 %v415_v12  ;;  %v3618_v12 = vld [vmem:[#allocation6 + $0x48] ss:$16 sps:$4 sm:$0xff]  }
 0x48b   :  { %667 = vmatpush1.bf16.msra.mxu0 %v3579_v11  ;;  %698 = vmatprep.mubr.bf16.mxu0 %v4124_v1  ;;  %v3620_v11 = vld [vmem:[#allocation6 + $0x4c] ss:$16 sps:$4 sm:$0xff]  }
 0x48c   :  { %668 = vmatprep.subr.bf16.mxu0 %v3584_v13  ;;  %v3626_v13 = vld [vmem:[#allocation6 + $0x6c] ss:$16 sps:$4 sm:$0xff]  }
 0x48f   :  { %669 = vmatpush1.bf16.msra.mxu0 %v3582_v14  ;;  %v3624_v14 = vld [vmem:[#allocation6 + $0x68] ss:$16 sps:$4 sm:$0xff]  }
 0x490   :  { %670 = vmatprep.subr.bf16.mxu0 %v3587_v15  ;;  %v3632_v15 = vld [vmem:[#allocation6 + $0x8c] ss:$16 sps:$4 sm:$0xff]  }
 0x493   :  { %671 = vmatpush1.bf16.msra.mxu0 %v3585_v16  ;;  %v3630_v16 = vld [vmem:[#allocation6 + $0x88] ss:$16 sps:$4 sm:$0xff]  }
 0x494   :  { %672 = vmatprep.subr.bf16.mxu0 %v3590_v17  ;;  %v3638_v17 = vld [vmem:[#allocation6 + $0xac] ss:$16 sps:$4 sm:$0xff]  }
 0x497   :  { %673 = vmatpush1.bf16.msra.mxu0 %v3588_v18  ;;  %v3636_v18 = vld [vmem:[#allocation6 + $0xa8] ss:$16 sps:$4 sm:$0xff]  }
 0x498   :  { %674 = vmatprep.subr.bf16.mxu0 %v3593_v19  ;;  %v3644_v19 = vld [vmem:[#allocation6 + $0xcc] ss:$16 sps:$4 sm:$0xff]  }
 0x49b   :  { %675 = vmatpush1.bf16.msra.mxu0 %v3591_v20  ;;  %v3642_v20 = vld [vmem:[#allocation6 + $0xc8] ss:$16 sps:$4 sm:$0xff]  }
 0x49c   :  { %676 = vmatprep.subr.bf16.mxu0 %v3596_v21  ;;  %v3650_v21 = vld [vmem:[#allocation6 + $0xec] ss:$16 sps:$4 sm:$0xff]  }
 0x49f   :  { %677 = vmatpush1.bf16.msra.mxu0 %v3594_v22  ;;  %v3648_v22 = vld [vmem:[#allocation6 + $0xe8] ss:$16 sps:$4 sm:$0xff]  }
 0x4a0   :  { %678 = vmatprep.subr.bf16.mxu0 %v3599_v23  ;;  %v3656_v23 = vld [vmem:[#allocation6 + $0x10c] ss:$16 sps:$4 sm:$0xff]  }
 0x4a3   :  { %679 = vmatpush1.bf16.msra.mxu0 %v3597_v24  ;;  %v3654_v24 = vld [vmem:[#allocation6 + $0x108] ss:$16 sps:$4 sm:$0xff]  }
 0x4a4   :  { %680 = vmatprep.subr.bf16.mxu0 %v3602_v25  ;;  %v3662_v25 = vld [vmem:[#allocation6 + $0x12c] ss:$16 sps:$4 sm:$0xff]  }
 0x4a7   :  { %681 = vmatpush1.bf16.msra.mxu0 %v3600_v26  ;;  %v3660_v26 = vld [vmem:[#allocation6 + $0x128] ss:$16 sps:$4 sm:$0xff]  }
 0x4a8   :  { %1168 = vmatprep.subr.bf16.mxu0 %v3608_v29  ;;  %v3674_v29 = vld [vmem:[#allocation6 + $0x16c] ss:$16 sps:$4 sm:$0xff]  }
 0x55d   :  { %v542_v61 = vpop.f32.mrb[8].mxu0 }
 0x55e   :  { %v543_v62 = vadd.f32 %v542_v61, %v421_v59  ;;  %v544_v63 = vpop.f32.mrb[9].mxu0 }
 0x55f   :  { %v545_v0 = vadd.f32 %v544_v63, %v425_v60  ;;  %v546_v1 = vpop.f32.mrb[10].mxu0 }
 0x560   :  { %v549_v2 = vmul.f32 0.4, %v543_v62  ;;  %v547_v3 = vpop.f32.mrb[11].mxu0 }
 0x561   :  { %v550_v4 = vmul.f32 0.4, %v545_v0 }
 0x562   :  { %v551_v5 = vmax.f32 %v543_v62, %v549_v2 }
 0x563   :  { %v552_v6 = vmax.f32 %v545_v0, %v550_v4 }
 0x565   :  { %v573_v8 = vpack.c.bf16 %v552_v6, %v551_v5 }
 0x567   :  { %699 = vmatmul.mubr.bf16.vlgmr.msra.gmra.mrb[12].mxu0 %v573_v8  ;;  %v3702_v8 = vld [vmem:[#allocation8 + $0x8] ss:$28 sps:$4 sm:$0xff]  }
 0x568   :  { %1169 = vmatpush1.bf16.msra.mxu0 %v3606_v7  ;;  %v3699_v7 = vld [vmem:[#allocation8] ss:$28 sps:$4 sm:$0xff]  }
 0x569   :  { %1170 = vmatprep.subr.bf16.mxu0 %v3614_v9  ;;  %v3707_v9 = vld [vmem:[#allocation8 + $0x3c] ss:$28 sps:$4 sm:$0xff]  }
 0x56c   :  { %1171 = vmatpush1.bf16.msra.mxu0 %v3612_v10  ;;  %v3710_v10 = vld [vmem:[#allocation8 + $0x44] ss:$28 sps:$4 sm:$0xff]  }
 0x56d   :  { %1172 = vmatprep.subr.bf16.mxu0 %v3620_v11  ;;  %v3705_v11 = vld [vmem:[#allocation8 + $0x38] ss:$28 sps:$4 sm:$0xff]  }
 0x570   :  { %1173 = vmatpush1.bf16.msra.mxu0 %v3618_v12  ;;  %v3708_v12 = vld [vmem:[#allocation8 + $0x40] ss:$28 sps:$4 sm:$0xff]  }
 0x571   :  { %1174 = vmatprep.subr.bf16.mxu0 %v3626_v13  ;;  %v3713_v13 = vld [vmem:[#allocation8 + $0x74] ss:$28 sps:$4 sm:$0xff]  }
 0x574   :  { %1175 = vmatpush1.bf16.msra.mxu0 %v3624_v14  ;;  %v3716_v14 = vld [vmem:[#allocation8 + $0x7c] ss:$28 sps:$4 sm:$0xff]  }
 0x575   :  { %1176 = vmatprep.subr.bf16.mxu0 %v3632_v15  ;;  %v3711_v15 = vld [vmem:[#allocation8 + $0x70] ss:$28 sps:$4 sm:$0xff]  }
 0x578   :  { %1177 = vmatpush1.bf16.msra.mxu0 %v3630_v16  ;;  %v3714_v16 = vld [vmem:[#allocation8 + $0x78] ss:$28 sps:$4 sm:$0xff]  }
 0x579   :  { %1178 = vmatprep.subr.bf16.mxu0 %v3638_v17  ;;  %v3719_v17 = vld [vmem:[#allocation8 + $0xac] ss:$28 sps:$4 sm:$0xff]  }
 0x57c   :  { %1179 = vmatpush1.bf16.msra.mxu0 %v3636_v18  ;;  %v3722_v18 = vld [vmem:[#allocation8 + $0xb4] ss:$28 sps:$4 sm:$0xff]  }
 0x57d   :  { %1180 = vmatprep.subr.bf16.mxu0 %v3644_v19  ;;  %v3717_v19 = vld [vmem:[#allocation8 + $0xa8] ss:$28 sps:$4 sm:$0xff]  }
 0x580   :  { %1181 = vmatpush1.bf16.msra.mxu0 %v3642_v20  ;;  %v3720_v20 = vld [vmem:[#allocation8 + $0xb0] ss:$28 sps:$4 sm:$0xff]  }
 0x581   :  { %1182 = vmatprep.subr.bf16.mxu0 %v3650_v21  ;;  %v3725_v21 = vld [vmem:[#allocation8 + $0xe4] ss:$28 sps:$4 sm:$0xff]  }
 0x584   :  { %1183 = vmatpush1.bf16.msra.mxu0 %v3648_v22  ;;  %v3728_v22 = vld [vmem:[#allocation8 + $0xec] ss:$28 sps:$4 sm:$0xff]  }
 0x585   :  { %1184 = vmatprep.subr.bf16.mxu0 %v3656_v23  ;;  %v3723_v23 = vld [vmem:[#allocation8 + $0xe0] ss:$28 sps:$4 sm:$0xff]  }
 0x588   :  { %1185 = vmatpush1.bf16.msra.mxu0 %v3654_v24  ;;  %v3726_v24 = vld [vmem:[#allocation8 + $0xe8] ss:$28 sps:$4 sm:$0xff]  }
 0x589   :  { %1186 = vmatprep.subr.bf16.mxu0 %v3662_v25  ;;  %v3731_v25 = vld [vmem:[#allocation8 + $0x11c] ss:$28 sps:$4 sm:$0xff]  }
 0x58c   :  { %1187 = vmatpush1.bf16.msra.mxu0 %v3660_v26  ;;  %v3734_v26 = vld [vmem:[#allocation8 + $0x124] ss:$28 sps:$4 sm:$0xff]  }
 0x58d   :  { %1188 = vmatprep.subr.bf16.mxu0 %v3668_v27  ;;  %v3729_v27 = vld [vmem:[#allocation8 + $0x118] ss:$28 sps:$4 sm:$0xff]  }
 0x590   :  { %1189 = vmatpush1.bf16.msra.mxu0 %v3666_v28  ;;  %v3732_v28 = vld [vmem:[#allocation8 + $0x120] ss:$28 sps:$4 sm:$0xff]  }
 0x591   :  { %1190 = vmatprep.subr.bf16.mxu0 %v3674_v29  ;;  %v3737_v29 = vld [vmem:[#allocation8 + $0x154] ss:$28 sps:$4 sm:$0xff]  }
 0x594   :  { %1191 = vmatpush1.bf16.msra.mxu0 %v3672_v30  ;;  %v3740_v30 = vld [vmem:[#allocation8 + $0x15c] ss:$28 sps:$4 sm:$0xff]  }
 0x595   :  { %1192 = vmatprep.subr.bf16.mxu0 %v3680_v31  ;;  %v3735_v31 = vld [vmem:[#allocation8 + $0x150] ss:$28 sps:$4 sm:$0xff]  }
 0x598   :  { %1193 = vmatpush1.bf16.msra.mxu0 %v3678_v32  ;;  %v3738_v32 = vld [vmem:[#allocation8 + $0x158] ss:$28 sps:$4 sm:$0xff]  }
 0x599   :  { %1194 = vmatprep.subr.bf16.mxu0 %v3686_v34  ;;  %v3746_v34 = vld [vmem:[#allocation8 + $0x194] ss:$28 sps:$4 sm:$0xff]  }
 0x59c   :  { %1195 = vmatpush1.bf16.msra.mxu0 %v3684_v36  ;;  %v3744_v36 = vld [vmem:[#allocation8 + $0x190] ss:$28 sps:$4 sm:$0xff]  }
 0x59d   :  { %1196 = vmatprep.subr.bf16.mxu0 %v3692_v38  ;;  %v3752_v38 = vld [vmem:[#allocation8 + $0x1cc] ss:$28 sps:$4 sm:$0xff]  }
 0x5a0   :  { %1197 = vmatpush1.bf16.msra.mxu0 %v3690_v40  ;;  %v3750_v40 = vld [vmem:[#allocation8 + $0x1c8] ss:$28 sps:$4 sm:$0xff]  }
 0x5a1   :  { %1198 = vmatprep.subr.bf16.mxu0 %v3698_v42  ;;  %v3758_v42 = vld [vmem:[#allocation8 + $0x204] ss:$28 sps:$4 sm:$0xff]  }
 0x5a4   :  { %1199 = vmatpush1.bf16.msra.mxu0 %v3696_v44  ;;  %v3756_v44 = vld [vmem:[#allocation8 + $0x200] ss:$28 sps:$4 sm:$0xff]  }
 0x5a5   :  { %2762 = vmatprep.subr.bf16.mxu0 %v3704_v46  ;;  %v3764_v46 = vld [vmem:[#allocation8 + $0x23c] ss:$28 sps:$4 sm:$0xff]  }
 0x63a   :  { %v700_v50 = vpop.f32.mrb[12].mxu0 }
 0x63b   :  { %v701_v51 = vadd.f32 %v700_v50, %v579_v48  ;;  %v702_v52 = vpop.f32.mrb[13].mxu0  ;;  %v3770_v50 = vld [vmem:[#allocation8 + $0x274] ss:$28 sps:$4 sm:$0xff]  }
 0x63c   :  { %v703_v53 = vadd.f32 %v702_v52, %v583_v49  ;;  %v704_v54 = vpop.f32.mrb[14].mxu0  ;;  %v3768_v52 = vld [vmem:[#allocation8 + $0x270] ss:$28 sps:$4 sm:$0xff]  }
 0x63d   :  { %v709_v57 = vmul.f32 0.4, %v701_v51  ;;  %v705_v59 = vadd.f32 %v704_v54, %v579_v48  ;;  %v706_v60 = vpop.f32.mrb[15].mxu0  ;;  %v3762_v48 = vld [vmem:[#allocation8 + $0x238] ss:$28 sps:$4 sm:$0xff]  }
 0x63e   :  { %v710_v61 = vmul.f32 0.4, %v703_v53  ;;  %v707_v62 = vadd.f32 %v706_v60, %v583_v49  ;;  %v3767_v49 = vld [vmem:[#allocation8 + $0x26c] ss:$28 sps:$4 sm:$0xff]   ;;  %v3779_v60 = vld [vmem:[#allocation8 + $0x2dc] ss:$28 sps:$4 sm:$0xff]  }
 0x63f   :  { %v711_v63 = vmul.f32 0.4, %v705_v59  ;;  %v713_v1 = vmax.f32 %v701_v51, %v709_v57  ;;  %v3765_v51 = vld [vmem:[#allocation8 + $0x268] ss:$28 sps:$4 sm:$0xff]   ;;  %v3771_v57 = vld [vmem:[#allocation8 + $0x2a0] ss:$28 sps:$4 sm:$0xff]  }
 0x640   :  { %v712_v0 = vmul.f32 0.4, %v707_v62  ;;  %v714_v3 = vmax.f32 %v703_v53, %v710_v61  ;;  %v3773_v53 = vld [vmem:[#allocation8 + $0x2a4] ss:$28 sps:$4 sm:$0xff]   ;;  %v3776_v54 = vld [vmem:[#allocation8 + $0x2ac] ss:$28 sps:$4 sm:$0xff]  }
 0x641   :  { %v715_v2 = vmax.f32 %v705_v59, %v711_v63  ;;  %v3774_v59 = vld [vmem:[#allocation8 + $0x2a8] ss:$28 sps:$4 sm:$0xff]   ;;  %v3780_v63 = vld [vmem:[#allocation8 + $0x2e0] ss:$28 sps:$4 sm:$0xff]  }
 0x642   :  { %v716_v4 = vmax.f32 %v707_v62, %v712_v0  ;;  %v3782_v61 = vld [vmem:[#allocation8 + $0x2e4] ss:$28 sps:$4 sm:$0xff]   ;;  %v3777_v62 = vld [vmem:[#allocation8 + $0x2d8] ss:$28 sps:$4 sm:$0xff]  }
 0x643   :  { %v717_v5 = vpack.c.bf16 %v715_v2, %v713_v1  ;;  %v3785_v0 = vld [vmem:[#allocation8 + $0x314] ss:$28 sps:$4 sm:$0xff]   ;;  %v3788_v1 = vld [vmem:[#allocation8 + $0x31c] ss:$28 sps:$4 sm:$0xff]  }
 0x644   :  { %v718_v6 = vpack.c.bf16 %v716_v4, %v714_v3  ;;  %v3783_v2 = vld [vmem:[#allocation8 + $0x310] ss:$28 sps:$4 sm:$0xff]   ;;  %v3786_v3 = vld [vmem:[#allocation8 + $0x318] ss:$28 sps:$4 sm:$0xff]  }
 0x645   :  { %v3791_v4 = vld [vmem:[#allocation8 + $0x34c] ss:$28 sps:$4 sm:$0xff]  }
 0x646   :  { %1157 = vmatprep.mubr.bf16.mxu1 %v718_v6  ;;  %1200 = vmatprep.mubr.bf16.mxu0 %v718_v6  ;;  %v3789_v6 = vld [vmem:[#allocation8 + $0x348] ss:$28 sps:$4 sm:$0xff]  }
 0x647   :  { %1158 = vmatmul.mubr.bf16.vlgmr.msra.gmra.mrb[12].mxu1 %v717_v5  ;;  %1201 = vmatmul.mubr.bf16.vlgmr.msra.gmra.mrb[16].mxu0 %v717_v5  ;;  %v3794_v5 = vld [vmem:[#allocation8 + $0x354] ss:$28 sps:$4 sm:$0xff]  }
 0x648   :  { %2677 = vmatpush1.bf16.msra.mxu1 %v3699_v7  ;;  %2763 = vmatpush1.bf16.msra.mxu0 %v3702_v8  ;;  %v3792_v7 = vld [vmem:[#allocation8 + $0x350] ss:$28 sps:$4 sm:$0xff]   ;;  %v3797_v8 = vld [vmem:[#allocation8 + $0x384] ss:$28 sps:$4 sm:$0xff]  }
 0x649   :  { %2678 = vmatprep.subr.bf16.mxu1 %v3707_v9  ;;  %2764 = vmatprep.subr.bf16.mxu0 %v3710_v10  ;;  %v3800_v9 = vld [vmem:[#allocation8 + $0x38c] ss:$28 sps:$4 sm:$0xff]   ;;  %v795_v10 = vsub.s32 2, %v4231_v55 }
 0x64c   :  { %2679 = vmatpush1.bf16.msra.mxu1 %v3705_v11  ;;  %2765 = vmatpush1.bf16.msra.mxu0 %v3708_v12  ;;  %v783_v11 = vld [vmem:[%s4318_s1 + $0x9] sm:$0xf]  ;;  %v799_v12 = vsub.s32 3, %v4231_v55 }
 0x64d   :  { %2680 = vmatprep.subr.bf16.mxu1 %v3713_v13  ;;  %2766 = vmatprep.subr.bf16.mxu0 %v3716_v14  ;;  %v788_v13 = vrot.slane %v783_v11, %v4234_v56  ;;  %v796_v14 = vrot.slane %v783_v11, %v795_v10 }
 0x650   :  { %2681 = vmatpush1.bf16.msra.mxu1 %v3711_v15  ;;  %2767 = vmatpush1.bf16.msra.mxu0 %v3714_v16  ;;  %v792_v15 = vrot.slane %v783_v11, %v4240_v58  ;;  %v800_v16 = vrot.slane %v783_v11, %v799_v12  ;;  %v3827_v11 = vld [vmem:[#allocation8 + $0x49c] ss:$28 sps:$4 sm:$0xff]  }
 0x651   :  { %2682 = vmatprep.subr.bf16.mxu1 %v3719_v17  ;;  %2768 = vmatprep.subr.bf16.mxu0 %v3722_v18 }
 0x654   :  { %2683 = vmatpush1.bf16.msra.mxu1 %v3717_v19  ;;  %2769 = vmatpush1.bf16.msra.mxu0 %v3720_v20 }
 0x655   :  { %2684 = vmatprep.subr.bf16.mxu1 %v3725_v21  ;;  %2770 = vmatprep.subr.bf16.mxu0 %v3728_v22 }
 0x658   :  { %2685 = vmatpush1.bf16.msra.mxu1 %v3723_v23  ;;  %2771 = vmatpush1.bf16.msra.mxu0 %v3726_v24 }
 0x659   :  { %2686 = vmatprep.subr.bf16.mxu1 %v3731_v25  ;;  %2772 = vmatprep.subr.bf16.mxu0 %v3734_v26 }
 0x65c   :  { %2687 = vmatpush1.bf16.msra.mxu1 %v3729_v27  ;;  %2773 = vmatpush1.bf16.msra.mxu0 %v3732_v28 }
 0x65d   :  { %2688 = vmatprep.subr.bf16.mxu1 %v3737_v29  ;;  %2774 = vmatprep.subr.bf16.mxu0 %v3740_v30 }
 0x660   :  { %2689 = vmatpush1.bf16.msra.mxu1 %v3735_v31  ;;  %2775 = vmatpush1.bf16.msra.mxu0 %v3738_v32 }
 0x661   :  { %2690 = vmatprep.subr.bf16.mxu1 %v3743_v33  ;;  %2776 = vmatprep.subr.bf16.mxu0 %v3746_v34 }
 0x664   :  { %2691 = vmatpush1.bf16.msra.mxu1 %v3741_v35  ;;  %2777 = vmatpush1.bf16.msra.mxu0 %v3744_v36 }
 0x665   :  { %2692 = vmatprep.subr.bf16.mxu1 %v3749_v37  ;;  %2778 = vmatprep.subr.bf16.mxu0 %v3752_v38 }
 0x668   :  { %2693 = vmatpush1.bf16.msra.mxu1 %v3747_v39  ;;  %2779 = vmatpush1.bf16.msra.mxu0 %v3750_v40 }
 0x669   :  { %2694 = vmatprep.subr.bf16.mxu1 %v3755_v41  ;;  %2780 = vmatprep.subr.bf16.mxu0 %v3758_v42 }
 0x66c   :  { %2695 = vmatpush1.bf16.msra.mxu1 %v3753_v43  ;;  %2781 = vmatpush1.bf16.msra.mxu0 %v3756_v44 }
 0x66d   :  { %2696 = vmatprep.subr.bf16.mxu1 %v3761_v45  ;;  %2782 = vmatprep.subr.bf16.mxu0 %v3764_v46 }
 0x670   :  { %2697 = vmatpush1.bf16.msra.mxu1 %v3759_v47  ;;  %2783 = vmatpush1.bf16.msra.mxu0 %v3762_v48 }
 0x671   :  { %2698 = vmatprep.subr.bf16.mxu1 %v3767_v49  ;;  %2784 = vmatprep.subr.bf16.mxu0 %v3770_v50 }
 0x674   :  { %2699 = vmatpush1.bf16.msra.mxu1 %v3765_v51  ;;  %2785 = vmatpush1.bf16.msra.mxu0 %v3768_v52 }
 0x675   :  { %2700 = vmatprep.subr.bf16.mxu1 %v3773_v53  ;;  %2786 = vmatprep.subr.bf16.mxu0 %v3776_v54  ;;  %v3795_v53 = vld [vmem:[#allocation8 + $0x380] ss:$28 sps:$4 sm:$0xff]   ;;  %v3798_v54 = vld [vmem:[#allocation8 + $0x388] ss:$28 sps:$4 sm:$0xff]  }
 0x678   :  { %2701 = vmatpush1.bf16.msra.mxu1 %v3771_v57  ;;  %2787 = vmatpush1.bf16.msra.mxu0 %v3774_v59  ;;  %v3803_v57 = vld [vmem:[#allocation8 + $0x3bc] ss:$28 sps:$4 sm:$0xff]   ;;  %v3806_v59 = vld [vmem:[#allocation8 + $0x3c4] ss:$28 sps:$4 sm:$0xff]  }
 0x679   :  { %2702 = vmatprep.subr.bf16.mxu1 %v3779_v60  ;;  %2788 = vmatprep.subr.bf16.mxu0 %v3782_v61  ;;  %v3801_v60 = vld [vmem:[#allocation8 + $0x3b8] ss:$28 sps:$4 sm:$0xff]   ;;  %v3804_v61 = vld [vmem:[#allocation8 + $0x3c0] ss:$28 sps:$4 sm:$0xff]  }
 0x67c   :  { %2703 = vmatpush1.bf16.msra.mxu1 %v3777_v62  ;;  %2789 = vmatpush1.bf16.msra.mxu0 %v3780_v63  ;;  %v3809_v62 = vld [vmem:[#allocation8 + $0x3f4] ss:$28 sps:$4 sm:$0xff]   ;;  %v3812_v63 = vld [vmem:[#allocation8 + $0x3fc] ss:$28 sps:$4 sm:$0xff]  }
 0x67d   :  { %2704 = vmatprep.subr.bf16.mxu1 %v3785_v0  ;;  %2790 = vmatprep.subr.bf16.mxu0 %v3788_v1  ;;  %v3807_v0 = vld [vmem:[#allocation8 + $0x3f0] ss:$28 sps:$4 sm:$0xff]   ;;  %v3810_v1 = vld [vmem:[#allocation8 + $0x3f8] ss:$28 sps:$4 sm:$0xff]  }
 0x680   :  { %2705 = vmatpush1.bf16.msra.mxu1 %v3783_v2  ;;  %2791 = vmatpush1.bf16.msra.mxu0 %v3786_v3  ;;  %v3815_v2 = vld [vmem:[#allocation8 + $0x42c] ss:$28 sps:$4 sm:$0xff]   ;;  %v3818_v3 = vld [vmem:[#allocation8 + $0x434] ss:$28 sps:$4 sm:$0xff]  }
 0x681   :  { %2706 = vmatprep.subr.bf16.mxu1 %v3791_v4  ;;  %2792 = vmatprep.subr.bf16.mxu0 %v3794_v5  ;;  %v3813_v4 = vld [vmem:[#allocation8 + $0x428] ss:$28 sps:$4 sm:$0xff]   ;;  %v3816_v5 = vld [vmem:[#allocation8 + $0x430] ss:$28 sps:$4 sm:$0xff]  }
 0x684   :  { %2707 = vmatpush1.bf16.msra.mxu1 %v3789_v6  ;;  %2793 = vmatpush1.bf16.msra.mxu0 %v3792_v7  ;;  %v3821_v6 = vld [vmem:[#allocation8 + $0x464] ss:$28 sps:$4 sm:$0xff]   ;;  %v3824_v7 = vld [vmem:[#allocation8 + $0x46c] ss:$28 sps:$4 sm:$0xff]  }
 0x685   :  { %2719 = vmatprep.subr.bf16.mxu1 %v3797_v8  ;;  %2805 = vmatprep.subr.bf16.mxu0 %v3800_v9  ;;  %v3819_v8 = vld [vmem:[#allocation8 + $0x460] ss:$28 sps:$4 sm:$0xff]   ;;  %v3822_v9 = vld [vmem:[#allocation8 + $0x468] ss:$28 sps:$4 sm:$0xff]  }
 0x71a   :  { %v1159_v17 = vpop.f32.mrb[12].mxu1  ;;  %v1202_v18 = vpop.f32.mrb[16].mxu0 }
 0x71b   :  { %v1160_v19 = vadd.f32 %v1159_v17, %v788_v13  ;;  %v1203_v20 = vadd.f32 %v1202_v18, %v796_v14  ;;  %v1161_v21 = vpop.f32.mrb[13].mxu1  ;;  %v1204_v22 = vpop.f32.mrb[17].mxu0  ;;  %v3836_v17 = vld [vmem:[#allocation8 + $0x4dc] ss:$28 sps:$4 sm:$0xff]   ;;  %v3831_v18 = vld [vmem:[#allocation8 + $0x4d0] ss:$28 sps:$4 sm:$0xff]  }
 0x71c   :  { %v1162_v23 = vadd.f32 %v1161_v21, %v792_v15  ;;  %v1205_v24 = vadd.f32 %v1204_v22, %v800_v16  ;;  %v1163_v25 = vpop.f32.mrb[14].mxu1  ;;  %v1206_v26 = vpop.f32.mrb[18].mxu0  ;;  %v3842_v21 = vld [vmem:[#allocation8 + $0x514] ss:$28 sps:$4 sm:$0xff]   ;;  %v3837_v22 = vld [vmem:[#allocation8 + $0x508] ss:$28 sps:$4 sm:$0xff]  }
 0x71d   :  { %v1211_v27 = vmul.f32 0.4, %v1160_v19  ;;  %v1213_v28 = vmul.f32 0.4, %v1203_v20  ;;  %v1164_v29 = vadd.f32 %v1163_v25, %v788_v13  ;;  %v1207_v30 = vadd.f32 %v1206_v26, %v796_v14  ;;  %v1165_v31 = vpop.f32.mrb[15].mxu1  ;;  %v1208_v32 = vpop.f32.mrb[19].mxu0 }
 0x71e   :  { %v1212_v33 = vmul.f32 0.4, %v1162_v23  ;;  %v1214_v34 = vmul.f32 0.4, %v1205_v24  ;;  %v1166_v35 = vadd.f32 %v1165_v31, %v792_v15  ;;  %v1209_v36 = vadd.f32 %v1208_v32, %v800_v16  ;;  %v3830_v13 = vld [vmem:[#allocation8 + $0x4a4] ss:$28 sps:$4 sm:$0xff]  }
 0x71f   :  { %v1215_v37 = vmul.f32 0.4, %v1164_v29  ;;  %v1217_v38 = vmul.f32 0.4, %v1207_v30  ;;  %v1219_v41 = vmax.f32 %v1160_v19, %v1211_v27  ;;  %v1221_v42 = vmax.f32 %v1203_v20, %v1213_v28  ;;  %v3825_v14 = vld [vmem:[#allocation8 + $0x498] ss:$28 sps:$4 sm:$0xff]  }
 0x720   :  { %v1216_v39 = vmul.f32 0.4, %v1166_v35  ;;  %v1218_v40 = vmul.f32 0.4, %v1209_v36  ;;  %v1220_v45 = vmax.f32 %v1162_v23, %v1212_v33  ;;  %v1222_v46 = vmax.f32 %v1205_v24, %v1214_v34  ;;  %v3828_v15 = vld [vmem:[#allocation8 + $0x4a0] ss:$28 sps:$4 sm:$0xff]  }
 0x721   :  { %v1223_v43 = vmax.f32 %v1164_v29, %v1215_v37  ;;  %v1225_v44 = vmax.f32 %v1207_v30, %v1217_v38  ;;  %v3833_v16 = vld [vmem:[#allocation8 + $0x4d4] ss:$28 sps:$4 sm:$0xff]   ;;  %v3839_v20 = vld [vmem:[#allocation8 + $0x50c] ss:$28 sps:$4 sm:$0xff]   ;;  %v3845_v24 = vld [vmem:[#allocation8 + $0x544] ss:$28 sps:$4 sm:$0xff]  }
 0x722   :  { %v1224_v47 = vmax.f32 %v1166_v35, %v1216_v39  ;;  %v1226_v48 = vmax.f32 %v1209_v36, %v1218_v40  ;;  %v3834_v19 = vld [vmem:[#allocation8 + $0x4d8] ss:$28 sps:$4 sm:$0xff]   ;;  %v3840_v23 = vld [vmem:[#allocation8 + $0x510] ss:$28 sps:$4 sm:$0xff]   ;;  %v3843_v26 = vld [vmem:[#allocation8 + $0x540] ss:$28 sps:$4 sm:$0xff]  }
 0x723   :  { %v4260_v49 = vpack.c.bf16 %v1223_v43, %v1219_v41  ;;  %v4262_v50 = vpack.c.bf16 %v1225_v44, %v1221_v42  ;;  %v3848_v25 = vld [vmem:[#allocation8 + $0x54c] ss:$28 sps:$4 sm:$0xff]   ;;  %v3851_v28 = vld [vmem:[#allocation8 + $0x57c] ss:$28 sps:$4 sm:$0xff]   ;;  %v3854_v29 = vld [vmem:[#allocation8 + $0x584] ss:$28 sps:$4 sm:$0xff]  }
 0x724   :  { %v4264_v51 = vpack.c.bf16 %v1224_v47, %v1220_v45  ;;  %v4266_v52 = vpack.c.bf16 %v1226_v48, %v1222_v46  ;;  %v3846_v27 = vld [vmem:[#allocation8 + $0x548] ss:$28 sps:$4 sm:$0xff]   ;;  %v3849_v30 = vld [vmem:[#allocation8 + $0x578] ss:$28 sps:$4 sm:$0xff]   ;;  %v3852_v31 = vld [vmem:[#allocation8 + $0x580] ss:$28 sps:$4 sm:$0xff]  }
 0x725   :  { %v3857_v32 = vld [vmem:[#allocation8 + $0x5b4] ss:$28 sps:$4 sm:$0xff]   ;;  %v3860_v33 = vld [vmem:[#allocation8 + $0x5bc] ss:$28 sps:$4 sm:$0xff]   ;;  %v3863_v36 = vld [vmem:[#allocation8 + $0x5ec] ss:$28 sps:$4 sm:$0xff]  }
 0x726   :  { %2708 = vmatprep.mubr.bf16.mxu1 %v4264_v51  ;;  %2794 = vmatprep.mubr.bf16.mxu0 %v4264_v51  ;;  %v3855_v34 = vld [vmem:[#allocation8 + $0x5b0] ss:$28 sps:$4 sm:$0xff]   ;;  %v3858_v35 = vld [vmem:[#allocation8 + $0x5b8] ss:$28 sps:$4 sm:$0xff]   ;;  %v3861_v38 = vld [vmem:[#allocation8 + $0x5e8] ss:$28 sps:$4 sm:$0xff]  }
 0x727   :  { %2709 = vmatmul.mubr.bf16.vlgmr.msra.gmra.mrb[16].mxu1 %v4260_v49  ;;  %2795 = vmatmul.mubr.bf16.vlgmr.msra.gmra.mrb[20].mxu0 %v4260_v49  ;;  %v3866_v37 = vld [vmem:[#allocation8 + $0x5f4] ss:$28 sps:$4 sm:$0xff]   ;;  %v3869_v40 = vld [vmem:[#allocation8 + $0x624] ss:$28 sps:$4 sm:$0xff]   ;;  %v3872_v41 = vld [vmem:[#allocation8 + $0x62c] ss:$28 sps:$4 sm:$0xff]  }
 0x728   :  { %2720 = vmatpush1.bf16.msra.mxu1 %v3795_v53  ;;  %2806 = vmatpush1.bf16.msra.mxu0 %v3798_v54  ;;  %v3864_v39 = vld [vmem:[#allocation8 + $0x5f0] ss:$28 sps:$4 sm:$0xff]   ;;  %v3867_v42 = vld [vmem:[#allocation8 + $0x620] ss:$28 sps:$4 sm:$0xff]   ;;  %v3870_v43 = vld [vmem:[#allocation8 + $0x628] ss:$28 sps:$4 sm:$0xff]  }
 0x729   :  { %2751 = vmatprep.mubr.bf16.mxu1 %v4266_v52  ;;  %2837 = vmatprep.mubr.bf16.mxu0 %v4266_v52  ;;  %v3875_v44 = vld [vmem:[#allocation8 + $0x65c] ss:$28 sps:$4 sm:$0xff]   ;;  %v3878_v45 = vld [vmem:[#allocation8 + $0x664] ss:$28 sps:$4 sm:$0xff]   ;;  %v3881_v48 = vld [vmem:[#allocation8 + $0x694] ss:$28 sps:$4 sm:$0xff]  }
 0x72a   :  { %2721 = vmatprep.subr.bf16.mxu1 %v3803_v57  ;;  %2807 = vmatprep.subr.bf16.mxu0 %v3806_v59  ;;  %v3873_v46 = vld [vmem:[#allocation8 + $0x658] ss:$28 sps:$4 sm:$0xff]   ;;  %v3876_v47 = vld [vmem:[#allocation8 + $0x660] ss:$28 sps:$4 sm:$0xff]   ;;  %v3879_v54 = vld [vmem:[#allocation8 + $0x690] ss:$28 sps:$4 sm:$0xff]  }
 0x72b   :  { %v3884_v53 = vld [vmem:[#allocation8 + $0x69c] ss:$28 sps:$4 sm:$0xff]   ;;  %v3887_v59 = vld [vmem:[#allocation8 + $0x6cc] ss:$28 sps:$4 sm:$0xff]  }
 0x72c   :  { %2722 = vmatpush1.bf16.msra.mxu1 %v3801_v60  ;;  %2808 = vmatpush1.bf16.msra.mxu0 %v3804_v61  ;;  %v3882_v57 = vld [vmem:[#allocation8 + $0x698] ss:$28 sps:$4 sm:$0xff]   ;;  %v3885_v61 = vld [vmem:[#allocation8 + $0x6c8] ss:$28 sps:$4 sm:$0xff]  }
 0x72d   :  { %2723 = vmatprep.subr.bf16.mxu1 %v3809_v62  ;;  %2809 = vmatprep.subr.bf16.mxu0 %v3812_v63  ;;  %v3890_v60 = vld [vmem:[#allocation8 + $0x6d4] ss:$28 sps:$4 sm:$0xff]  }
 0x72e   :  { %v3888_v62 = vld [vmem:[#allocation8 + $0x6d0] ss:$28 sps:$4 sm:$0xff]  }
 0x72f   :  { %v3893_v63 = vld [vmem:[#allocation8 + $0x14] ss:$28 sps:$4 sm:$0xff]  }
 0x730   :  { %2724 = vmatpush1.bf16.msra.mxu1 %v3807_v0  ;;  %2810 = vmatpush1.bf16.msra.mxu0 %v3810_v1  ;;  %v3894_v0 = vld [vmem:[#allocation8 + $0x1d8] ss:$28 sps:$4 sm:$0xff]   ;;  %v3891_v1 = vld [vmem:[#allocation8 + $0x10] ss:$28 sps:$4 sm:$0xff]  }
 0x731   :  { %2725 = vmatprep.subr.bf16.mxu1 %v3815_v2  ;;  %2811 = vmatprep.subr.bf16.mxu0 %v3818_v3  ;;  %v3895_v2 = vld [vmem:[#allocation8 + $0x18] ss:$28 sps:$4 sm:$0xff]   ;;  %v3898_v3 = vld [vmem:[#allocation8 + $0x4c] ss:$28 sps:$4 sm:$0xff]  }
 0x734   :  { %2726 = vmatpush1.bf16.msra.mxu1 %v3813_v4  ;;  %2812 = vmatpush1.bf16.msra.mxu0 %v3816_v5  ;;  %v3899_v4 = vld [vmem:[#allocation8 + $0x210] ss:$28 sps:$4 sm:$0xff]   ;;  %v3896_v5 = vld [vmem:[#allocation8 + $0x48] ss:$28 sps:$4 sm:$0xff]  }
 0x735   :  { %2727 = vmatprep.subr.bf16.mxu1 %v3821_v6  ;;  %2813 = vmatprep.subr.bf16.mxu0 %v3824_v7  ;;  %v3900_v6 = vld [vmem:[#allocation8 + $0x50] ss:$28 sps:$4 sm:$0xff]   ;;  %v3903_v7 = vld [vmem:[#allocation8 + $0x84] ss:$28 sps:$4 sm:$0xff]  }
 0x738   :  { %2728 = vmatpush1.bf16.msra.mxu1 %v3819_v8  ;;  %2814 = vmatpush1.bf16.msra.mxu0 %v3822_v9  ;;  %v3904_v8 = vld [vmem:[#allocation8 + $0x248] ss:$28 sps:$4 sm:$0xff]   ;;  %v3901_v9 = vld [vmem:[#allocation8 + $0x80] ss:$28 sps:$4 sm:$0xff]  }
 0x739   :  { %2729 = vmatprep.subr.bf16.mxu1 %v3827_v11  ;;  %2815 = vmatprep.subr.bf16.mxu0 %v3830_v13  ;;  %v3905_v11 = vld [vmem:[#allocation8 + $0x88] ss:$28 sps:$4 sm:$0xff]   ;;  %v3908_v13 = vld [vmem:[#allocation8 + $0xbc] ss:$28 sps:$4 sm:$0xff]  }
 0x73c   :  { %2730 = vmatpush1.bf16.msra.mxu1 %v3825_v14  ;;  %2816 = vmatpush1.bf16.msra.mxu0 %v3828_v15  ;;  %v3909_v14 = vld [vmem:[#allocation8 + $0x280] ss:$28 sps:$4 sm:$0xff]   ;;  %v3906_v15 = vld [vmem:[#allocation8 + $0xb8] ss:$28 sps:$4 sm:$0xff]  }
 0x73d   :  { %2731 = vmatprep.subr.bf16.mxu1 %v3833_v16  ;;  %2817 = vmatprep.subr.bf16.mxu0 %v3836_v17  ;;  %v3910_v16 = vld [vmem:[#allocation8 + $0xc0] ss:$28 sps:$4 sm:$0xff]   ;;  %v3913_v17 = vld [vmem:[#allocation8 + $0xf4] ss:$28 sps:$4 sm:$0xff]  }
 0x740   :  { %2732 = vmatpush1.bf16.msra.mxu1 %v3831_v18  ;;  %2818 = vmatpush1.bf16.msra.mxu0 %v3834_v19  ;;  %v3911_v18 = vld [vmem:[#allocation8 + $0xf0] ss:$28 sps:$4 sm:$0xff]   ;;  %v3915_v19 = vld [vmem:[#allocation8 + $0xf8] ss:$28 sps:$4 sm:$0xff]  }
 0x741   :  { %2733 = vmatprep.subr.bf16.mxu1 %v3839_v20  ;;  %2819 = vmatprep.subr.bf16.mxu0 %v3842_v21  ;;  %v3918_v20 = vld [vmem:[#allocation8 + $0x12c] ss:$28 sps:$4 sm:$0xff]  }
 0x742   :  { %v3919_v21 = vld [vmem:[#allocation8 + $0x2f0] ss:$28 sps:$4 sm:$0xff]  }
 0x744   :  { %2734 = vmatpush1.bf16.msra.mxu1 %v3837_v22  ;;  %2820 = vmatpush1.bf16.msra.mxu0 %v3840_v23  ;;  %v3916_v22 = vld [vmem:[#allocation8 + $0x128] ss:$28 sps:$4 sm:$0xff]   ;;  %v3920_v23 = vld [vmem:[#allocation8 + $0x130] ss:$28 sps:$4 sm:$0xff]  }
 0x745   :  { %2735 = vmatprep.subr.bf16.mxu1 %v3845_v24  ;;  %2821 = vmatprep.subr.bf16.mxu0 %v3848_v25  ;;  %v3923_v24 = vld [vmem:[#allocation8 + $0x164] ss:$28 sps:$4 sm:$0xff]  }
 0x746   :  { %v3924_v25 = vld [vmem:[#allocation8 + $0x328] ss:$28 sps:$4 sm:$0xff]  }
 0x748   :  { %2736 = vmatpush1.bf16.msra.mxu1 %v3843_v26  ;;  %2822 = vmatpush1.bf16.msra.mxu0 %v3846_v27  ;;  %v3921_v26 = vld [vmem:[#allocation8 + $0x160] ss:$28 sps:$4 sm:$0xff]   ;;  %v3925_v27 = vld [vmem:[#allocation8 + $0x168] ss:$28 sps:$4 sm:$0xff]  }
 0x749   :  { %2737 = vmatprep.subr.bf16.mxu1 %v3851_v28  ;;  %2823 = vmatprep.subr.bf16.mxu0 %v3854_v29  ;;  %v3928_v28 = vld [vmem:[#allocation8 + $0x19c] ss:$28 sps:$4 sm:$0xff]  }
 0x74a   :  { %v3929_v29 = vld [vmem:[#allocation8 + $0x360] ss:$28 sps:$4 sm:$0xff]  }
 0x74c   :  { %2738 = vmatpush1.bf16.msra.mxu1 %v3849_v30  ;;  %2824 = vmatpush1.bf16.msra.mxu0 %v3852_v31  ;;  %v3926_v30 = vld [vmem:[#allocation8 + $0x198] ss:$28 sps:$4 sm:$0xff]   ;;  %v3930_v31 = vld [vmem:[#allocation8 + $0x1a0] ss:$28 sps:$4 sm:$0xff]  }
 0x74d   :  { %2739 = vmatprep.subr.bf16.mxu1 %v3857_v32  ;;  %2825 = vmatprep.subr.bf16.mxu0 %v3860_v33  ;;  %v3933_v32 = vld [vmem:[#allocation8 + $0x1d4] ss:$28 sps:$4 sm:$0xff]  }
 0x74e   :  { %v3934_v33 = vld [vmem:[#allocation8 + $0x558] ss:$28 sps:$4 sm:$0xff]  }
 0x750   :  { %2740 = vmatpush1.bf16.msra.mxu1 %v3855_v34  ;;  %2826 = vmatpush1.bf16.msra.mxu0 %v3858_v35  ;;  %v3931_v34 = vld [vmem:[#allocation8 + $0x1d0] ss:$28 sps:$4 sm:$0xff]   ;;  %v3935_v35 = vld [vmem:[#allocation8 + $0x398] ss:$28 sps:$4 sm:$0xff]  }
 0x751   :  { %2741 = vmatprep.subr.bf16.mxu1 %v3863_v36  ;;  %2827 = vmatprep.subr.bf16.mxu0 %v3866_v37  ;;  %v3938_v36 = vld [vmem:[#allocation8 + $0x20c] ss:$28 sps:$4 sm:$0xff]  }
 0x752   :  { %v3939_v37 = vld [vmem:[#allocation8 + $0x590] ss:$28 sps:$4 sm:$0xff]  }
 0x754   :  { %2742 = vmatpush1.bf16.msra.mxu1 %v3861_v38  ;;  %2828 = vmatpush1.bf16.msra.mxu0 %v3864_v39  ;;  %v3936_v38 = vld [vmem:[#allocation8 + $0x208] ss:$28 sps:$4 sm:$0xff]   ;;  %v3940_v39 = vld [vmem:[#allocation8 + $0x3d0] ss:$28 sps:$4 sm:$0xff]  }
 0x755   :  { %2743 = vmatprep.subr.bf16.mxu1 %v3869_v40  ;;  %2829 = vmatprep.subr.bf16.mxu0 %v3872_v41  ;;  %v3943_v40 = vld [vmem:[#allocation8 + $0x244] ss:$28 sps:$4 sm:$0xff]  }
 0x756   :  { %v3944_v41 = vld [vmem:[#allocation8 + $0x5c8] ss:$28 sps:$4 sm:$0xff]  }
 0x758   :  { %2744 = vmatpush1.bf16.msra.mxu1 %v3867_v42  ;;  %2830 = vmatpush1.bf16.msra.mxu0 %v3870_v43  ;;  %v3941_v42 = vld [vmem:[#allocation8 + $0x240] ss:$28 sps:$4 sm:$0xff]   ;;  %v3945_v43 = vld [vmem:[#allocation8 + $0x408] ss:$28 sps:$4 sm:$0xff]  }
 0x759   :  { %2745 = vmatprep.subr.bf16.mxu1 %v3875_v44  ;;  %2831 = vmatprep.subr.bf16.mxu0 %v3878_v45  ;;  %v3948_v44 = vld [vmem:[#allocation8 + $0x27c] ss:$28 sps:$4 sm:$0xff]  }
 0x75a   :  { %v3949_v45 = vld [vmem:[#allocation8 + $0x600] ss:$28 sps:$4 sm:$0xff]  }
 0x75c   :  { %2746 = vmatpush1.bf16.msra.mxu1 %v3873_v46  ;;  %2832 = vmatpush1.bf16.msra.mxu0 %v3876_v47  ;;  %v3946_v46 = vld [vmem:[#allocation8 + $0x278] ss:$28 sps:$4 sm:$0xff]   ;;  %v3950_v47 = vld [vmem:[#allocation8 + $0x440] ss:$28 sps:$4 sm:$0xff]  }
 0x75d   :  { %2747 = vmatprep.subr.bf16.mxu1 %v3881_v48  ;;  %2833 = vmatprep.subr.bf16.mxu0 %v3884_v53  ;;  %v3953_v48 = vld [vmem:[#allocation8 + $0x2b4] ss:$28 sps:$4 sm:$0xff]  }
 0x75e   :  { %v3954_v53 = vld [vmem:[#allocation8 + $0x638] ss:$28 sps:$4 sm:$0xff]  }
 0x760   :  { %2748 = vmatpush1.bf16.msra.mxu1 %v3879_v54  ;;  %2834 = vmatpush1.bf16.msra.mxu0 %v3882_v57  ;;  %v3951_v54 = vld [vmem:[#allocation8 + $0x2b0] ss:$28 sps:$4 sm:$0xff]   ;;  %v3955_v57 = vld [vmem:[#allocation8 + $0x478] ss:$28 sps:$4 sm:$0xff]  }
 0x761   :  { %2749 = vmatprep.subr.bf16.mxu1 %v3887_v59  ;;  %2835 = vmatprep.subr.bf16.mxu0 %v3890_v60  ;;  %v3958_v59 = vld [vmem:[#allocation8 + $0x2ec] ss:$28 sps:$4 sm:$0xff]  }
 0x762   :  { %v3959_v60 = vld [vmem:[#allocation8 + $0x670] ss:$28 sps:$4 sm:$0xff]  }
 0x764   :  { %2750 = vmatpush1.bf16.msra.mxu1 %v3885_v61  ;;  %2836 = vmatpush1.bf16.msra.mxu0 %v3888_v62  ;;  %v3956_v61 = vld [vmem:[#allocation8 + $0x2e8] ss:$28 sps:$4 sm:$0xff]   ;;  %v3960_v62 = vld [vmem:[#allocation8 + $0x4b0] ss:$28 sps:$4 sm:$0xff]  }
 0x765   :  { %2848 = vmatprep.subr.bf16.mxu1 %v3893_v63  ;;  %3427 = vmatprep.subr.bf16.mxu0 %v3894_v0  ;;  %v3963_v63 = vld [vmem:[#allocation8 + $0x324] ss:$28 sps:$4 sm:$0xff]  }
 0x766   :  { %v3964_v0 = vld [vmem:[#allocation8 + $0x6a8] ss:$28 sps:$4 sm:$0xff]  }
 0x767   :  { %2752 = vmatmul.mubr.bf16.vlgmr.msra.gmra.mrb[16].mxu1 %v4262_v50  ;;  %2838 = vmatmul.mubr.bf16.vlgmr.msra.gmra.mrb[20].mxu0 %v4262_v50 }
 0x768   :  { %2849 = vmatpush1.bf16.msra.mxu1 %v3891_v1  ;;  %2880 = vmatprep.mubr.bf16.mxu1 %v4264_v51  ;;  %v3961_v1 = vld [vmem:[#allocation8 + $0x320] ss:$28 sps:$4 sm:$0xff]  }
 0x769   :  { %3428 = vmatpush3.bf16.msra.mxu0 %v3895_v2  ;;  %2966 = vmatprep.mubr.bf16.mxu0 %v4264_v51  ;;  %v3914_v51 = vld [vmem:[#allocation8 + $0x2b8] ss:$28 sps:$4 sm:$0xff]   ;;  %v3965_v2 = vld [vmem:[#allocation8 + $0x4e8] ss:$28 sps:$4 sm:$0xff]  }
 0x76a   :  { %2850 = vmatprep.subr.bf16.mxu1 %v3898_v3  ;;  %3429 = vmatprep.subr.bf16.mxu0 %v3899_v4  ;;  %v3968_v3 = vld [vmem:[#allocation8 + $0x35c] ss:$28 sps:$4 sm:$0xff]  }
 0x76b   :  { %v3969_v4 = vld [vmem:[#allocation8 + $0x6e0] ss:$28 sps:$4 sm:$0xff]  }
 0x76c   :  { %2851 = vmatpush1.bf16.msra.mxu1 %v3896_v5  ;;  %v3966_v5 = vld [vmem:[#allocation8 + $0x358] ss:$28 sps:$4 sm:$0xff]  }
 0x76d   :  { %3430 = vmatpush3.bf16.msra.mxu0 %v3900_v6  ;;  %2852 = vmatprep.subr.bf16.mxu1 %v3903_v7  ;;  %v3970_v6 = vld [vmem:[#allocation8 + $0x520] ss:$28 sps:$4 sm:$0xff]   ;;  %v3973_v7 = vld [vmem:[#allocation8 + $0x394] ss:$28 sps:$4 sm:$0xff]  }
 0x76e   :  { %3431 = vmatprep.subr.bf16.mxu0 %v3904_v8  ;;  %v3971_v8 = vld [vmem:[#allocation8 + $0x390] ss:$28 sps:$4 sm:$0xff]  }
 0x770   :  { %2853 = vmatpush1.bf16.msra.mxu1 %v3901_v9  ;;  %v3976_v9 = vld [vmem:[#allocation8 + $0x3cc] ss:$28 sps:$4 sm:$0xff]  }
 0x771   :  { %3432 = vmatpush3.bf16.msra.mxu0 %v3905_v11  ;;  %2854 = vmatprep.subr.bf16.mxu1 %v3908_v13  ;;  %v3974_v11 = vld [vmem:[#allocation8 + $0x3c8] ss:$28 sps:$4 sm:$0xff]  }
 0x772   :  { %3433 = vmatprep.subr.bf16.mxu0 %v3909_v14  ;;  %v3979_v13 = vld [vmem:[#allocation8 + $0x404] ss:$28 sps:$4 sm:$0xff]  }
 0x773   :  { %v3977_v14 = vld [vmem:[#allocation8 + $0x400] ss:$28 sps:$4 sm:$0xff]  }
 0x774   :  { %2855 = vmatpush1.bf16.msra.mxu1 %v3906_v15  ;;  %v3982_v15 = vld [vmem:[#allocation8 + $0x43c] ss:$28 sps:$4 sm:$0xff]  }
 0x775   :  { %3434 = vmatpush3.bf16.msra.mxu0 %v3910_v16  ;;  %2856 = vmatprep.subr.bf16.mxu1 %v3913_v17  ;;  %v3980_v16 = vld [vmem:[#allocation8 + $0x438] ss:$28 sps:$4 sm:$0xff]  }
 0x776   :  { %3435 = vmatprep.subr.bf16.mxu0 %v3914_v51  ;;  %v3985_v17 = vld [vmem:[#allocation8 + $0x474] ss:$28 sps:$4 sm:$0xff]  }
 0x777   :  { %v3983_v51 = vld [vmem:[#allocation8 + $0x470] ss:$28 sps:$4 sm:$0xff]  }
 0x778   :  { %2857 = vmatpush1.bf16.msra.mxu1 %v3911_v18  ;;  %v3986_v18 = vld [vmem:[#allocation8 + $0x4a8] ss:$28 sps:$4 sm:$0xff]  }
 0x779   :  { %3436 = vmatpush3.bf16.msra.mxu0 %v3915_v19  ;;  %2858 = vmatprep.subr.bf16.mxu1 %v3918_v20  ;;  %v3991_v19 = vld [vmem:[#allocation8 + $0x4e4] ss:$28 sps:$4 sm:$0xff]   ;;  %v3994_v20 = vld [vmem:[#allocation8 + $0x51c] ss:$28 sps:$4 sm:$0xff]  }
 0x77a   :  { %3437 = vmatprep.subr.bf16.mxu0 %v3919_v21  ;;  %v3992_v21 = vld [vmem:[#allocation8 + $0x518] ss:$28 sps:$4 sm:$0xff]  }
 0x77c   :  { %2859 = vmatpush1.bf16.msra.mxu1 %v3916_v22  ;;  %v3997_v22 = vld [vmem:[#allocation8 + $0x554] ss:$28 sps:$4 sm:$0xff]  }
 0x77d   :  { %3438 = vmatpush3.bf16.msra.mxu0 %v3920_v23  ;;  %2860 = vmatprep.subr.bf16.mxu1 %v3923_v24  ;;  %v3995_v23 = vld [vmem:[#allocation8 + $0x550] ss:$28 sps:$4 sm:$0xff]  }
 0x77e   :  { %3439 = vmatprep.subr.bf16.mxu0 %v3924_v25  ;;  %v4000_v24 = vld [vmem:[#allocation8 + $0x58c] ss:$28 sps:$4 sm:$0xff]  }
 0x77f   :  { %v3998_v25 = vld [vmem:[#allocation8 + $0x588] ss:$28 sps:$4 sm:$0xff]  }
 0x780   :  { %2861 = vmatpush1.bf16.msra.mxu1 %v3921_v26  ;;  %v4003_v26 = vld [vmem:[#allocation8 + $0x5c4] ss:$28 sps:$4 sm:$0xff]  }
 0x781   :  { %3440 = vmatpush3.bf16.msra.mxu0 %v3925_v27  ;;  %2862 = vmatprep.subr.bf16.mxu1 %v3928_v28  ;;  %v4001_v27 = vld [vmem:[#allocation8 + $0x5c0] ss:$28 sps:$4 sm:$0xff]  }
 0x782   :  { %3441 = vmatprep.subr.bf16.mxu0 %v3929_v29  ;;  %v4006_v28 = vld [vmem:[#allocation8 + $0x5fc] ss:$28 sps:$4 sm:$0xff]  }
 0x783   :  { %v4004_v29 = vld [vmem:[#allocation8 + $0x5f8] ss:$28 sps:$4 sm:$0xff]  }
 0x784   :  { %2863 = vmatpush1.bf16.msra.mxu1 %v3926_v30  ;;  %v4009_v30 = vld [vmem:[#allocation8 + $0x634] ss:$28 sps:$4 sm:$0xff]  }
 0x785   :  { %3442 = vmatpush3.bf16.msra.mxu0 %v3930_v31  ;;  %2864 = vmatprep.subr.bf16.mxu1 %v3933_v32  ;;  %v4007_v31 = vld [vmem:[#allocation8 + $0x630] ss:$28 sps:$4 sm:$0xff]  }
 0x786   :  { %3449 = vmatprep.subr.bf16.mxu0 %v3934_v33  ;;  %v4012_v32 = vld [vmem:[#allocation8 + $0x66c] ss:$28 sps:$4 sm:$0xff]  }
 0x787   :  { %v4010_v33 = vld [vmem:[#allocation8 + $0x668] ss:$28 sps:$4 sm:$0xff]  }
 0x788   :  { %2967 = vmatmul.mubr.bf16.vlgmr.msra.gmra.mrb[24].mxu0 %v4260_v49  ;;  %2865 = vmatpush1.bf16.msra.mxu1 %v3931_v34  ;;  %v4015_v34 = vld [vmem:[#allocation8 + $0x6a4] ss:$28 sps:$4 sm:$0xff]  }
 0x789   :  { %3450 = vmatpush3.bf16.msra.mxu0 %v3935_v35  ;;  %3007 = vmatprep.mubr.bf16.mxu0 %v4266_v52  ;;  %v4013_v35 = vld [vmem:[#allocation8 + $0x6a0] ss:$28 sps:$4 sm:$0xff]  }
 0x78a   :  { %2866 = vmatprep.subr.bf16.mxu1 %v3938_v36  ;;  %3451 = vmatprep.subr.bf16.mxu0 %v3939_v37  ;;  %v4018_v36 = vld [vmem:[#allocation8 + $0x6dc] ss:$28 sps:$4 sm:$0xff]  }
 0x78b   :  { %v4016_v37 = vld [vmem:[#allocation8 + $0x6d8] ss:$28 sps:$4 sm:$0xff]  }
 0x78c   :  { %2867 = vmatpush1.bf16.msra.mxu1 %v3936_v38  ;;  %v4287_v38 = vld [vmem:[%s4318_s1 + $0xd] sm:$0xff]  ;;  %s4125_s1 = smov [#allocation9]  }
 0x78d   :  { %3452 = vmatpush3.bf16.msra.mxu0 %v3940_v39  ;;  %2868 = vmatprep.subr.bf16.mxu1 %v3943_v40  ;;  %v1492_v39 = vrot.slane %v4287_v38, %v4234_v56  ;;  %v1500_v40 = vrot.slane %v4287_v38, %v795_v10  ;;  %s3063_s25 = sshll.u32 %s4125_s1, 4  ;;  %s3064_s25 = int_to_ptr.vmem [resolvable:$true] %s3063_s25 }
 0x78e   :  { %3453 = vmatprep.subr.bf16.mxu0 %v3944_v41  ;;  %v1496_v41 = vrot.slane %v4287_v38, %v4240_v58  ;;  %s4085_s26 = scalar_lea.vmem %s3064_s25, 1792  ;;  %p4090_p11 = scmp.lt.s32.totalorder %s3064_s25, %s3064_s25 }
 0x78f   :  { %p4086_p10 = scmp.ne.s32.totalorder %s3064_s25, %s4085_s26  ;;  %p4091_p12 = scmp.lt.s32.totalorder %s4085_s26, %s4085_s26 }
 0x790   :  { %2869 = vmatpush1.bf16.msra.mxu1 %v3941_v42  ;;  %v1504_v42 = vrot.slane %v4287_v38, %v799_v12 }
 0x791   :  { %3454 = vmatpush3.bf16.msra.mxu0 %v3945_v43  ;;  %2870 = vmatprep.subr.bf16.mxu1 %v3948_v44  ;;  %p4092_p13 = por %p4091_p12, %p4090_p11 }
 0x792   :  { %3455 = vmatprep.subr.bf16.mxu0 %v3949_v45 }
 0x793   :  { %p4093_p0 = pnand %p4092_p13, %p4086_p10 }
 0x794   :  { %2871 = vmatpush1.bf16.msra.mxu1 %v3946_v46 }
 0x795   :  { %3456 = vmatpush3.bf16.msra.mxu0 %v3950_v47  ;;  %2872 = vmatprep.subr.bf16.mxu1 %v3953_v48 }
 0x796   :  { %3457 = vmatprep.subr.bf16.mxu0 %v3954_v53 }
 0x798   :  { %2873 = vmatpush1.bf16.msra.mxu1 %v3951_v54 }
 0x799   :  { %3458 = vmatpush3.bf16.msra.mxu0 %v3955_v57  ;;  %2874 = vmatprep.subr.bf16.mxu1 %v3958_v59 }
 0x79a   :  { %3459 = vmatprep.subr.bf16.mxu0 %v3959_v60 }
 0x79c   :  { %2875 = vmatpush1.bf16.msra.mxu1 %v3956_v61 }
 0x79d   :  { %3460 = vmatpush3.bf16.msra.mxu0 %v3960_v62  ;;  %2876 = vmatprep.subr.bf16.mxu1 %v3963_v63 }
 0x79e   :  { %3461 = vmatprep.subr.bf16.mxu0 %v3964_v0 }
 0x7a0   :  { %2877 = vmatpush1.bf16.msra.mxu1 %v3961_v1 }
 0x7a1   :  { %3462 = vmatpush3.bf16.msra.mxu0 %v3965_v2  ;;  %2878 = vmatprep.subr.bf16.mxu1 %v3968_v3 }
 0x7a2   :  { %3463 = vmatprep.subr.bf16.mxu0 %v3969_v4 }
 0x7a4   :  { %2879 = vmatpush1.bf16.msra.mxu1 %v3966_v5 }
 0x7a5   :  { %3464 = vmatpush3.bf16.msra.mxu0 %v3970_v6  ;;  %2891 = vmatprep.subr.bf16.mxu1 %v3973_v7 }
 0x7a7   :  { %2881 = vmatmul.mubr.bf16.vlgmr.msra.gmra.mrb[20].mxu1 %v4260_v49  ;;  %v3988_v49 = vld [vmem:[#allocation8 + $0x4ac] ss:$28 sps:$4 sm:$0xff]  }
 0x7a8   :  { %3008 = vmatmul.mubr.bf16.vlgmr.msra.gmra.mrb[28].mxu0 %v4262_v50  ;;  %2892 = vmatpush1.bf16.msra.mxu1 %v3971_v8 }
 0x7a9   :  { %2923 = vmatprep.mubr.bf16.mxu1 %v4266_v52  ;;  %2893 = vmatprep.subr.bf16.mxu1 %v3976_v9  ;;  %v3989_v52 = vld [vmem:[#allocation8 + $0x4e0] ss:$28 sps:$4 sm:$0xff]  }
 0x7ac   :  { %2894 = vmatpush1.bf16.msra.mxu1 %v3974_v11 }
 0x7ad   :  { %2895 = vmatprep.subr.bf16.mxu1 %v3979_v13 }
 0x7b0   :  { %2896 = vmatpush1.bf16.msra.mxu1 %v3977_v14 }
 0x7b1   :  { %2897 = vmatprep.subr.bf16.mxu1 %v3982_v15 }
 0x7b4   :  { %2898 = vmatpush1.bf16.msra.mxu1 %v3980_v16 }
 0x7b5   :  { %2899 = vmatprep.subr.bf16.mxu1 %v3985_v17 }
 0x7b8   :  { %2900 = vmatpush1.bf16.msra.mxu1 %v3983_v51 }
 0x7b9   :  { %2901 = vmatprep.subr.bf16.mxu1 %v3988_v49 }
 0x7bc   :  { %2902 = vmatpush1.bf16.msra.mxu1 %v3986_v18 }
 0x7bd   :  { %2903 = vmatprep.subr.bf16.mxu1 %v3991_v19  ;;  %v1515_v19 = vsub.s32 6, %v4231_v55 }
 0x7c0   :  { %2904 = vmatpush1.bf16.msra.mxu1 %v3989_v52  ;;  %v1516_v52 = vrot.slane %v4287_v38, %v1515_v19 }
 0x7c1   :  { %2905 = vmatprep.subr.bf16.mxu1 %v3994_v20 }
 0x7c4   :  { %2906 = vmatpush1.bf16.msra.mxu1 %v3992_v21 }
 0x7c5   :  { %2907 = vmatprep.subr.bf16.mxu1 %v3997_v22 }
 0x7c8   :  { %2908 = vmatpush1.bf16.msra.mxu1 %v3995_v23 }
 0x7c9   :  { %2909 = vmatprep.subr.bf16.mxu1 %v4000_v24 }
 0x7cc   :  { %2910 = vmatpush1.bf16.msra.mxu1 %v3998_v25 }
 0x7cd   :  { %2911 = vmatprep.subr.bf16.mxu1 %v4003_v26 }
 0x7d0   :  { %2912 = vmatpush1.bf16.msra.mxu1 %v4001_v27 }
 0x7d1   :  { %2913 = vmatprep.subr.bf16.mxu1 %v4006_v28 }
 0x7d4   :  { %2914 = vmatpush1.bf16.msra.mxu1 %v4004_v29 }
 0x7d5   :  { %2915 = vmatprep.subr.bf16.mxu1 %v4009_v30 }
 0x7d8   :  { %2916 = vmatpush1.bf16.msra.mxu1 %v4007_v31 }
 0x7d9   :  { %2917 = vmatprep.subr.bf16.mxu1 %v4012_v32 }
 0x7dc   :  { %2918 = vmatpush1.bf16.msra.mxu1 %v4010_v33 }
 0x7dd   :  { %2919 = vmatprep.subr.bf16.mxu1 %v4015_v34  ;;  %v1507_v34 = vsub.s32 4, %v4231_v55 }
 0x7e0   :  { %2920 = vmatpush1.bf16.msra.mxu1 %v4013_v35  ;;  %v1511_v35 = vsub.s32 5, %v4231_v55 }
 0x7e1   :  { %2921 = vmatprep.subr.bf16.mxu1 %v4018_v36  ;;  %v1508_v36 = vrot.slane %v4287_v38, %v1507_v34 }
 0x7e4   :  { %2922 = vmatpush1.bf16.msra.mxu1 %v4016_v37  ;;  %v1512_v37 = vrot.slane %v4287_v38, %v1511_v35 }
 0x7e7   :  { %2924 = vmatmul.mubr.bf16.vlgmr.msra.gmra.mrb[20].mxu1 %v4262_v50 }
 0x83a   :  { %v2753_v50 = vpop.f32.mrb[16].mxu1  ;;  %v2839_v43 = vpop.f32.mrb[20].mxu0 }
 0x83b   :  { %v3509_v44 = vadd.f32 %v2753_v50, %v1492_v39  ;;  %v3513_v45 = vadd.f32 %v2839_v43, %v1500_v40  ;;  %v2755_v46 = vpop.f32.mrb[17].mxu1  ;;  %v2841_v47 = vpop.f32.mrb[21].mxu0 }
 0x83c   :  { %v3510_v48 = vadd.f32 %v2755_v46, %v1496_v41  ;;  %v3514_v53 = vadd.f32 %v2841_v47, %v1504_v42  ;;  %v2757_v56 = vpop.f32.mrb[18].mxu1  ;;  %v2843_v54 = vpop.f32.mrb[22].mxu0 }
 0x83d   :  { %v3016_v57 = vmul.f32 0.4, %v3509_v44  ;;  %v3018_v59 = vmul.f32 0.4, %v3513_v45  ;;  %v3511_v10 = vadd.f32 %v2757_v56, %v1492_v39  ;;  %v3515_v60 = vadd.f32 %v2843_v54, %v1500_v40  ;;  %v2759_v61 = vpop.f32.mrb[19].mxu1  ;;  %v2845_v58 = vpop.f32.mrb[23].mxu0 }
 0x83e   :  { %v3017_v62 = vmul.f32 0.4, %v3510_v48  ;;  %v3019_v63 = vmul.f32 0.4, %v3514_v53  ;;  %v3512_v0 = vadd.f32 %v2759_v61, %v1496_v41  ;;  %v3516_v12 = vadd.f32 %v2845_v58, %v1504_v42 }
 0x83f   :  { %v3030_v1 = vmax.f32 %v3509_v44, %v3016_v57  ;;  %v3032_v2 = vmax.f32 %v3513_v45, %v3018_v59  ;;  %v3023_v3 = vmul.f32 0.4, %v3511_v10  ;;  %v3025_v4 = vmul.f32 0.4, %v3515_v60 }
 0x840   :  { %v3031_v5 = vmax.f32 %v3510_v48, %v3017_v62  ;;  %v3033_v6 = vmax.f32 %v3514_v53, %v3019_v63  ;;  %v3024_v7 = vmul.f32 0.4, %v3512_v0  ;;  %v3026_v8 = vmul.f32 0.4, %v3516_v12 }
 0x841   :  { %3044 = vst [vmem:[#allocation9] sm:$0xff] %v3030_v1  ;;  %3046 = vst [vmem:[#allocation9 + $0x10] sm:$0xff] %v3032_v2  ;;  %v3037_v9 = vmax.f32 %v3511_v10, %v3023_v3  ;;  %v3039_v11 = vmax.f32 %v3515_v60, %v3025_v4 }
 0x842   :  { %3045 = vst [vmem:[#allocation9 + $0x8] sm:$0xff] %v3031_v5  ;;  %3047 = vst [vmem:[#allocation9 + $0x18] sm:$0xff] %v3033_v6  ;;  %v3038_v13 = vmax.f32 %v3512_v0, %v3024_v7  ;;  %v3040_v14 = vmax.f32 %v3516_v12, %v3026_v8 }
 0x843   :  { %3051 = vst [vmem:[#allocation9 + $0x38] sm:$0xff] %v3037_v9  ;;  %3053 = vst [vmem:[#allocation9 + $0x48] sm:$0xff] %v3039_v11 }
 0x844   :  { %3052 = vst [vmem:[#allocation9 + $0x40] sm:$0xff] %v3038_v13  ;;  %3054 = vst [vmem:[#allocation9 + $0x50] sm:$0xff] %v3040_v14 }
 0x85b   :  { %v3443_v15 = vpop.f32.mrb[24].mxu0 }
 0x85c   :  { %v3444_v16 = vpop.f32.mrb[25].mxu0 }
 0x85d   :  { %v3445_v17 = vadd.f32 %v3444_v16, %v3443_v15  ;;  %v3446_v51 = vpop.f32.mrb[26].mxu0 }
 0x85e   :  { %v3447_v49 = vpop.f32.mrb[27].mxu0 }
 0x85f   :  { %v3448_v18 = vadd.f32 %v3447_v49, %v3446_v51  ;;  %v2969_v22 = vadd.f32 %v3445_v17, %v1516_v52 }
 0x861   :  { %v2972_v26 = vadd.f32 %v3448_v18, %v1516_v52 }
 0x87b   :  { %v3465_v20 = vpop.f32.mrb[28].mxu0 }
 0x87c   :  { %v3466_v21 = vpop.f32.mrb[29].mxu0 }
 0x87d   :  { %v3467_v23 = vadd.f32 %v3466_v21, %v3465_v20  ;;  %v3468_v24 = vpop.f32.mrb[30].mxu0 }
 0x87e   :  { %v3469_v25 = vpop.f32.mrb[31].mxu0 }
 0x87f   :  { %v3010_v27 = vadd.f32 %v3467_v23, %v2969_v22  ;;  %v3470_v28 = vadd.f32 %v3469_v25, %v3468_v24 }
 0x881   :  { %v3022_v29 = vmul.f32 0.4, %v3010_v27  ;;  %v3013_v30 = vadd.f32 %v3470_v28, %v2972_v26 }
 0x883   :  { %v3036_v31 = vmax.f32 %v3010_v27, %v3022_v29  ;;  %v3029_v32 = vmul.f32 0.4, %v3013_v30 }
 0x885   :  { %3050 = vst [vmem:[#allocation9 + $0x30] sm:$0xff] %v3036_v31  ;;  %v3043_v33 = vmax.f32 %v3013_v30, %v3029_v32 }
 0x887   :  { %3057 = vst [vmem:[#allocation9 + $0x68] sm:$0xff] %v3043_v33 }
 0x8ba   :  { %v2925_v39 = vpop.f32.mrb[20].mxu1 }
 0x8bb   :  { %v3517_v40 = vadd.f32 %v2925_v39, %v1508_v36  ;;  %v2927_v41 = vpop.f32.mrb[21].mxu1 }
 0x8bc   :  { %v3518_v42 = vadd.f32 %v2927_v41, %v1512_v37  ;;  %v2929_v50 = vpop.f32.mrb[22].mxu1 }
 0x8bd   :  { %v3020_v43 = vmul.f32 0.4, %v3517_v40  ;;  %v3519_v44 = vadd.f32 %v2929_v50, %v1508_v36  ;;  %v2931_v45 = vpop.f32.mrb[23].mxu1 }
 0x8be   :  { %v3021_v46 = vmul.f32 0.4, %v3518_v42  ;;  %v3520_v47 = vadd.f32 %v2931_v45, %v1512_v37 }
 0x8bf   :  { %v3034_v48 = vmax.f32 %v3517_v40, %v3020_v43  ;;  %v3027_v53 = vmul.f32 0.4, %v3519_v44 }
 0x8c0   :  { %v3035_v56 = vmax.f32 %v3518_v42, %v3021_v46  ;;  %v3028_v55 = vmul.f32 0.4, %v3520_v47 }
 0x8c1   :  { %3048 = vst [vmem:[#allocation9 + $0x20] sm:$0xff] %v3034_v48  ;;  %v3041_v54 = vmax.f32 %v3519_v44, %v3027_v53 }
 0x8c2   :  { %3049 = vst [vmem:[#allocation9 + $0x28] sm:$0xff] %v3035_v56  ;;  %v3042_v38 = vmax.f32 %v3520_v47, %v3028_v55 }
 0x8c3   :  { %3055 = vst [vmem:[#allocation9 + $0x58] sm:$0xff] %v3041_v54 }
 0x8c4   :  { %3056 = vst [vmem:[#allocation9 + $0x60] sm:$0xff] %v3042_v38 }
 0x8c5   :  { %4096 = shalt.err (!%p4093_p0)
}
 0x8c6   :  { %s4097_s29 = scalar_lea.hbm %s4322_s5, 1792 }
 0x8c7   :  { %p4098_p1 = scmp.ne.s32.totalorder %s4322_s5, %s4097_s29  ;;  %p4101_p2 = scmp.lt.u32.totalorder %s4097_s29, %s4322_s5 }
 0x8c9   :  { %p4103_p3 = pnand %p4101_p2, %p4098_p1 }
 0x8cb   :  { %4106 = shalt.err (!%p4103_p3)
}
 0x8cc   :  { %s4126_s8 = smov 896   ;;  %s4127_s4 = smov 56  }
 0x8cd   :  { %3069 = dma.vmem_to_hbm [thread:$0]  %s3064_s25, 1792, %s4322_s5, [#allocation5], %s4126_s8, %s4126_s8, %s4127_s4  }
 0x8ce   :  { %4111 = dma.done.wait [#allocation5], 1792  }
 0x8cf   :  { %4112 = vsyncadd [#allocation5], 4294965504 }
 0x8d0   :  { %3073 = vsyncpa [#allocation4], 1 }
 0x8d1   :  { %3074 = vsyncpa [#allocation7], 1 }
 0x8d2   :  { %3075 = vsyncpa [#allocation5], 1 }

</bundles_post_ra>
